<compile_context>
chip_gen: v7x
topology: tpu7x:2x2x1
jax: 0.10.0
libtpu: 0.0.40
codegen_flags: <defaults>
</compile_context>

<pallas_src>
import functools

import jax
import jax.numpy as jnp
from jax.experimental import pallas as pl
from jax.experimental.pallas import tpu as pltpu


def _dkt_kernel(L, N, H, M,
                x_ref,    # (L*N, C2+1)   [x | 1]
                w1_ref,   # (C2+1, 2H+1)  -> [k | v | 1]
                w2_ref,   # (2H+1, 4*128) -> 128-padded [km(k)|k@ws1+bs|v@we+be|v@wa+ba]
                ws2_ref,  # (H, H)        summary_r half
                wo_ref,   # (H, 1)        output weight
                bo_ref,   # (1, 1)        output bias scalar, SMEM
                y_ref):   # (L*N, 1)
    f32 = jnp.float32
    SEG = 128

    # ---------------- batched pre-pass: two fused MXU matmuls ---------------
    kv1 = jnp.dot(x_ref[...], w1_ref[...], preferred_element_type=f32)   # (LN, 2H+1)
    res = jnp.dot(kv1, w2_ref[...], preferred_element_type=f32)          # (LN, 4*128)

    logits = res[:, 0:M]                                  # km(k)       (LN, M)
    pre    = res[:, SEG:SEG + H]                          # k@ws1 + bs  (LN, H)
    e_all  = jax.nn.sigmoid(res[:, 2 * SEG:2 * SEG + H])  # erase gates (LN, H)
    a_all  = jnp.tanh(res[:, 3 * SEG:3 * SEG + H])        # add vectors (LN, H)

    # softmax over the M memory slots (exact reciprocal; off any serial path)
    logits = logits - jnp.max(logits, axis=-1, keepdims=True)
    ex = jnp.exp(logits)
    w_all = ex * pl.reciprocal(jnp.sum(ex, axis=-1, keepdims=True), approx=False)

    # ------------- x-only per-step tensors of the memory recurrence ---------
    #   mem_t = mem_{t-1} * decay_t + add_t     (elementwise on (N, M, H))
    wb, decay, add = [], [], []
    for t in range(L):
        r0 = t * N
        w_t = w_all[r0:r0 + N, :][:, :, None]             # (N, M, 1)
        wb.append(w_t)
        if t < L - 1:                                     # last step's update is never read
            e_t = e_all[r0:r0 + N, :][:, None, :]         # (N, 1, H)
            a_t = a_all[r0:r0 + N, :][:, None, :]         # (N, 1, H)
            decay.append(1.0 - w_t * e_t)                 # (N, M, H)
            add.append(w_t * a_t)                         # (N, M, H)

    # ------------- associative (Hillis-Steele) scan, depth log2(L-1) --------
    # After the scan, B[j] == mem after applying steps 0..j to mem_0 = 0,
    # so the memory read by step t is B[t-1].
    A, B = list(decay), list(add)
    n = L - 1
    shift = 1
    while shift < n:
        last = (shift * 2) >= n
        A_new, B_new = list(A), list(B)
        for j in range(shift, n):
            B_new[j] = A[j] * B[j - shift] + B[j]
            if not last:                                  # A is dead after the final stage
                A_new[j] = A[j] * A[j - shift]
        A, B = A_new, B_new
        shift *= 2

    # ------------- read weights r_t (independent across t) ------------------
    r_parts = [jnp.zeros((N, H), f32)]                    # r_0: memory starts at zero
    for t in range(1, L):
        r_parts.append(jnp.sum(B[t - 1] * wb[t], axis=1))  # (N, H) sublane reduce over M
    r_all = jnp.concatenate(r_parts, axis=0)              # (LN, H)

    # ------------- batched summary + output head (single MXU matmuls) -------
    f_all = jnp.tanh(pre + jnp.dot(r_all, ws2_ref[...], preferred_element_type=f32))
    y = jnp.dot(f_all, wo_ref[...], preferred_element_type=f32) + bo_ref[0, 0]
    y_ref[...] = jax.nn.sigmoid(y)                        # (LN, 1), single dense store


@functools.partial(jax.jit, static_argnames=("hidden_size", "memory_size"))
def dkt_forward(x, params, *, hidden_size, memory_size):
    """x: (L, N, C2) float32. Returns sigmoid predictions (L, N, 1)."""
    L, N, C2 = x.shape
    H, M = hidden_size, memory_size
    LN = L * N
    SEG = 128
    f32 = jnp.float32

    # Rows = all timesteps; append a constant-1 column so biases fold into W1/W2.
    x2 = x.reshape(LN, C2)
    x_aug = jnp.concatenate([x2, jnp.ones((LN, 1), f32)], axis=1)         # (LN, C2+1)

    # Fused matmul 1: x_aug @ W1 -> [k | v | 1].
    # q = x[:, :C] + x[:, C:] is folded into the weight via vstack([wk, wk]).
    wk_folded = jnp.concatenate([params["wk"], params["wk"]], axis=0)     # (C2, H)
    W1 = jnp.zeros((C2 + 1, 2 * H + 1), f32)
    W1 = W1.at[:C2, :H].set(wk_folded)
    W1 = W1.at[:C2, H:2 * H].set(params["wv"])
    W1 = W1.at[C2, :H].set(params["bk"][0])
    W1 = W1.at[C2, H:2 * H].set(params["bv"][0])
    W1 = W1.at[C2, 2 * H].set(1.0)                 # carry the ones column through

    # Fused matmul 2: [k|v|1] @ W2 -> 128-lane-padded segments
    #   [ km(k) | k@ws1+bs | v@we+be | v@wa+ba ]
    W2 = jnp.zeros((2 * H + 1, 4 * SEG), f32)
    W2 = W2.at[:H, 0:M].set(params["wkm"])
    W2 = W2.at[:H, SEG:SEG + H].set(params["ws1"])
    W2 = W2.at[H:2 * H, 2 * SEG:2 * SEG + H].set(params["we"])
    W2 = W2.at[H:2 * H, 3 * SEG:3 * SEG + H].set(params["wa"])
    W2 = W2.at[2 * H, SEG:SEG + H].set(params["bs"][0])
    W2 = W2.at[2 * H, 2 * SEG:2 * SEG + H].set(params["be"][0])
    W2 = W2.at[2 * H, 3 * SEG:3 * SEG + H].set(params["ba"][0])

    bo = params["bo"].reshape(1, 1)

    vspec = lambda shape: pl.BlockSpec(shape, lambda i, _s=shape: (0,) * len(_s))
    kernel = functools.partial(_dkt_kernel, L, N, H, M)

    y2 = pl.pallas_call(
        kernel,
        out_shape=jax.ShapeDtypeStruct((LN, 1), f32),
        grid=(1,),
        in_specs=[
            vspec((LN, C2 + 1)),                   # x (all timesteps, +ones col)
            vspec((C2 + 1, 2 * H + 1)),            # fused [key_embed(folded q) | value_embed]
            vspec((2 * H + 1, 4 * SEG)),           # fused, 128-padded [km | ws1 | erase | add]
            vspec((H, H)),                         # summary_r
            vspec((H, 1)),                         # output weight
            pl.BlockSpec(memory_space=pltpu.MemorySpace.SMEM),  # output bias scalar
        ],
        out_specs=vspec((LN, 1)),
        compiler_params=pltpu.CompilerParams(
            dimension_semantics=("arbitrary",),
        ),
    )(x_aug, W1, W2, params["ws2"], params["wo"], bo)

    return y2.reshape(L, N, 1)


def dkt_reference(x, params):
    """Pure-JAX reference matching the PyTorch forward (eval mode)."""
    L, N, C2 = x.shape
    C = C2 // 2

    def step(mem, x_t):
        q = x_t.reshape(N, 2, C).sum(axis=1)
        k = q @ params["wk"] + params["bk"][0]
        w = jax.nn.softmax(k @ params["wkm"], axis=-1)
        r = (mem * w[:, None, :]).sum(axis=2)
        f = jnp.tanh(k @ params["ws1"] + r @ params["ws2"] + params["bs"][0])
        y = f @ params["wo"] + params["bo"][0]
        v = x_t @ params["wv"] + params["bv"][0]
        e = jax.nn.sigmoid(v @ params["we"] + params["be"][0])
        a = jnp.tanh(v @ params["wa"] + params["ba"][0])
        mem = mem * (1.0 - w[:, None, :] * e[:, :, None])
        mem = mem + w[:, None, :] * a[:, :, None]
        return mem, jax.nn.sigmoid(y)

    H = params["wk"].shape[1]
    M = params["wkm"].shape[1]
    m0 = jnp.zeros((N, H, M), jnp.float32)
    _, ys = jax.lax.scan(step, m0, x)
    return ys


def init_params(key, input_size, hidden_size, memory_size):
    C2, H, M = input_size, hidden_size, memory_size
    C = C2 // 2
    ks = jax.random.split(key, 13)
    u = lambda k, shape, fan_in: jax.random.uniform(
        k, shape, jnp.float32, -1.0, 1.0) / jnp.sqrt(jnp.float32(fan_in))
    return {
        "wk": u(ks[0], (C, H), C),      "bk": u(ks[1], (1, H), C),
        "wkm": u(ks[2], (H, M), H),
        "ws1": u(ks[3], (H, H), 2 * H), "ws2": u(ks[4], (H, H), 2 * H),
        "bs": u(ks[5], (1, H), 2 * H),
        "wo": u(ks[6], (H, 1), H),      "bo": u(ks[7], (1, 1), H),
        "wv": u(ks[8], (C2, H), C2),    "bv": u(ks[9], (1, H), C2),
        "we": u(ks[10], (H, H), H),     "be": u(ks[11], (1, H), H),
        "wa": u(ks[12], (H, H), H),     "ba": u(jax.random.fold_in(key, 99), (1, H), H),
    }


if __name__ == "__main__":
    # cfg.data.input_size = 16, cfg.model.hidden_size = 32, cfg.model.memory_size = 16
    L, N, C2, H, M = 8, 4, 16, 32, 16

    key = jax.random.PRNGKey(0)
    kx, kp = jax.random.split(key)
    x = jax.random.normal(kx, (L, N, C2), jnp.float32)
    params = init_params(kp, C2, H, M)

    y = dkt_forward(x, params, hidden_size=H, memory_size=M)
    y = jax.block_until_ready(y)

    y_ref = jax.block_until_ready(dkt_reference(x, params))
    assert y.shape == (L, N, 1)
    assert jnp.allclose(y, y_ref, atol=1e-5, rtol=1e-5), "mismatch vs reference"

    print("KERNEL_OK")
</pallas_src>

<mosaic_0001>
module attributes {stable_mosaic.version = 11 : i64} {
  func.func @_dkt_kernel(%arg0: i32, %arg1: memref<32x17xf32, #tpu.memory_space<vmem>>, %arg2: memref<17x65xf32, #tpu.memory_space<vmem>>, %arg3: memref<65x512xf32, #tpu.memory_space<vmem>>, %arg4: memref<32x32xf32, #tpu.memory_space<vmem>>, %arg5: memref<32x1xf32, #tpu.memory_space<vmem>>, %arg6: memref<1x1xf32, #tpu.memory_space<smem>>, %arg7: memref<32x1xf32, #tpu.memory_space<vmem>>) attributes {dimension_semantics = [#tpu.dimension_semantics<arbitrary>], iteration_bounds = array<i64: 1>, scalar_prefetch = 0 : i64, scratch_operands = 0 : i64, tpu.core_type = #tpu.core_type<tc>, window_params = [{pipeline_mode = #tpu.pipeline_mode<synchronous>, transform_indices = @transform_0, window_bounds = array<i64: 32, 17>}, {pipeline_mode = #tpu.pipeline_mode<synchronous>, transform_indices = @transform_1, window_bounds = array<i64: 17, 65>}, {pipeline_mode = #tpu.pipeline_mode<synchronous>, transform_indices = @transform_2, window_bounds = array<i64: 65, 512>}, {pipeline_mode = #tpu.pipeline_mode<synchronous>, transform_indices = @transform_3, window_bounds = array<i64: 32, 32>}, {pipeline_mode = #tpu.pipeline_mode<synchronous>, transform_indices = @transform_4, window_bounds = array<i64: 32, 1>}, {transform_indices = @transform_5, window_bounds = array<i64: 1, 1>}, {pipeline_mode = #tpu.pipeline_mode<synchronous>, transform_indices = @transform_6, window_bounds = array<i64: 32, 1>}]} {
    %c0 = arith.constant 0 : index
    %c0_0 = arith.constant 0 : index
    %0 = vector.load %arg1[%c0, %c0_0] : memref<32x17xf32, #tpu.memory_space<vmem>>, vector<32x17xf32>
    %c0_1 = arith.constant 0 : index
    %c0_2 = arith.constant 0 : index
    %1 = vector.load %arg2[%c0_1, %c0_2] : memref<17x65xf32, #tpu.memory_space<vmem>>, vector<17x65xf32>
    %cst = arith.constant dense<0.000000e+00> : vector<32x65xf32>
    %2 = tpu.matmul %0, %1, %cst {dimension_numbers = #tpu.dot_dimension_numbers<[1], [0], [0], [1], [0, 0, 1, 1], [], []>} : vector<32x17xf32>, vector<17x65xf32>, vector<32x65xf32> -> vector<32x65xf32>
    %c0_3 = arith.constant 0 : index
    %c0_4 = arith.constant 0 : index
    %3 = vector.load %arg3[%c0_3, %c0_4] : memref<65x512xf32, #tpu.memory_space<vmem>>, vector<65x512xf32>
    %cst_5 = arith.constant dense<0.000000e+00> : vector<32x512xf32>
    %4 = tpu.matmul %2, %3, %cst_5 {dimension_numbers = #tpu.dot_dimension_numbers<[1], [0], [0], [1], [0, 0, 1, 1], [], []>} : vector<32x65xf32>, vector<65x512xf32>, vector<32x512xf32> -> vector<32x512xf32>
    %5 = vector.extract_strided_slice %4 {offsets = [0, 0], sizes = [32, 16], strides = [1, 1]} : vector<32x512xf32> to vector<32x16xf32>
    %6 = vector.extract_strided_slice %4 {offsets = [0, 128], sizes = [32, 32], strides = [1, 1]} : vector<32x512xf32> to vector<32x32xf32>
    %7 = vector.extract_strided_slice %4 {offsets = [0, 256], sizes = [32, 32], strides = [1, 1]} : vector<32x512xf32> to vector<32x32xf32>
    %8 = arith.negf %7 : vector<32x32xf32>
    %9 = math.exp %8 : vector<32x32xf32>
    %cst_6 = arith.constant 1.000000e+00 : f32
    %10 = vector.broadcast %cst_6 : f32 to vector<32x32xf32>
    %11 = arith.addf %10, %9 : vector<32x32xf32>
    %12 = arith.divf %10, %11 : vector<32x32xf32>
    %13 = vector.extract_strided_slice %4 {offsets = [0, 384], sizes = [32, 32], strides = [1, 1]} : vector<32x512xf32> to vector<32x32xf32>
    %14 = math.tanh %13 : vector<32x32xf32>
    %cst_7 = arith.constant dense<0xFF800000> : vector<32xf32>
    %15 = vector.multi_reduction <maximumf>, %5, %cst_7 [1] : vector<32x16xf32> to vector<32xf32>
    %16 = vector.shape_cast %15 : vector<32xf32> to vector<32x1xf32>
    %17 = vector.broadcast %16 : vector<32x1xf32> to vector<32x16xf32>
    %18 = arith.subf %5, %17 : vector<32x16xf32>
    %19 = math.exp %18 : vector<32x16xf32>
    %cst_8 = arith.constant dense<0.000000e+00> : vector<32xf32>
    %20 = vector.multi_reduction <add>, %19, %cst_8 [1] : vector<32x16xf32> to vector<32xf32>
    %21 = vector.shape_cast %20 : vector<32xf32> to vector<32x1xf32>
    %22 = tpu.reciprocal %21 : vector<32x1xf32> -> vector<32x1xf32>
    %23 = vector.broadcast %22 : vector<32x1xf32> to vector<32x16xf32>
    %24 = arith.mulf %19, %23 : vector<32x16xf32>
    %25 = vector.extract_strided_slice %24 {offsets = [0, 0], sizes = [4, 16], strides = [1, 1]} : vector<32x16xf32> to vector<4x16xf32>
    %26 = vector.shape_cast %25 : vector<4x16xf32> to vector<4x16x1xf32>
    %27 = vector.extract_strided_slice %14 {offsets = [0, 0], sizes = [4, 32], strides = [1, 1]} : vector<32x32xf32> to vector<4x32xf32>
    %28 = vector.shape_cast %27 : vector<4x32xf32> to vector<4x1x32xf32>
    %29 = vector.broadcast %26 : vector<4x16x1xf32> to vector<4x16x32xf32>
    %30 = vector.broadcast %28 : vector<4x1x32xf32> to vector<4x16x32xf32>
    %31 = arith.mulf %29, %30 : vector<4x16x32xf32>
    %32 = vector.extract_strided_slice %24 {offsets = [4, 0], sizes = [4, 16], strides = [1, 1]} : vector<32x16xf32> to vector<4x16xf32>
    %33 = vector.shape_cast %32 : vector<4x16xf32> to vector<4x16x1xf32>
    %34 = vector.extract_strided_slice %12 {offsets = [4, 0], sizes = [4, 32], strides = [1, 1]} : vector<32x32xf32> to vector<4x32xf32>
    %35 = vector.shape_cast %34 : vector<4x32xf32> to vector<4x1x32xf32>
    %36 = vector.extract_strided_slice %14 {offsets = [4, 0], sizes = [4, 32], strides = [1, 1]} : vector<32x32xf32> to vector<4x32xf32>
    %37 = vector.shape_cast %36 : vector<4x32xf32> to vector<4x1x32xf32>
    %38 = vector.broadcast %33 : vector<4x16x1xf32> to vector<4x16x32xf32>
    %39 = vector.broadcast %35 : vector<4x1x32xf32> to vector<4x16x32xf32>
    %40 = arith.mulf %38, %39 : vector<4x16x32xf32>
    %cst_9 = arith.constant 1.000000e+00 : f32
    %41 = vector.broadcast %cst_9 : f32 to vector<4x16x32xf32>
    %42 = arith.subf %41, %40 : vector<4x16x32xf32>
    %43 = vector.broadcast %33 : vector<4x16x1xf32> to vector<4x16x32xf32>
    %44 = vector.broadcast %37 : vector<4x1x32xf32> to vector<4x16x32xf32>
    %45 = arith.mulf %43, %44 : vector<4x16x32xf32>
    %46 = vector.extract_strided_slice %24 {offsets = [8, 0], sizes = [4, 16], strides = [1, 1]} : vector<32x16xf32> to vector<4x16xf32>
    %47 = vector.shape_cast %46 : vector<4x16xf32> to vector<4x16x1xf32>
    %48 = vector.extract_strided_slice %12 {offsets = [8, 0], sizes = [4, 32], strides = [1, 1]} : vector<32x32xf32> to vector<4x32xf32>
    %49 = vector.shape_cast %48 : vector<4x32xf32> to vector<4x1x32xf32>
    %50 = vector.extract_strided_slice %14 {offsets = [8, 0], sizes = [4, 32], strides = [1, 1]} : vector<32x32xf32> to vector<4x32xf32>
    %51 = vector.shape_cast %50 : vector<4x32xf32> to vector<4x1x32xf32>
    %52 = vector.broadcast %47 : vector<4x16x1xf32> to vector<4x16x32xf32>
    %53 = vector.broadcast %49 : vector<4x1x32xf32> to vector<4x16x32xf32>
    %54 = arith.mulf %52, %53 : vector<4x16x32xf32>
    %cst_10 = arith.constant 1.000000e+00 : f32
    %55 = vector.broadcast %cst_10 : f32 to vector<4x16x32xf32>
    %56 = arith.subf %55, %54 : vector<4x16x32xf32>
    %57 = vector.broadcast %47 : vector<4x16x1xf32> to vector<4x16x32xf32>
    %58 = vector.broadcast %51 : vector<4x1x32xf32> to vector<4x16x32xf32>
    %59 = arith.mulf %57, %58 : vector<4x16x32xf32>
    %60 = vector.extract_strided_slice %24 {offsets = [12, 0], sizes = [4, 16], strides = [1, 1]} : vector<32x16xf32> to vector<4x16xf32>
    %61 = vector.shape_cast %60 : vector<4x16xf32> to vector<4x16x1xf32>
    %62 = vector.extract_strided_slice %12 {offsets = [12, 0], sizes = [4, 32], strides = [1, 1]} : vector<32x32xf32> to vector<4x32xf32>
    %63 = vector.shape_cast %62 : vector<4x32xf32> to vector<4x1x32xf32>
    %64 = vector.extract_strided_slice %14 {offsets = [12, 0], sizes = [4, 32], strides = [1, 1]} : vector<32x32xf32> to vector<4x32xf32>
    %65 = vector.shape_cast %64 : vector<4x32xf32> to vector<4x1x32xf32>
    %66 = vector.broadcast %61 : vector<4x16x1xf32> to vector<4x16x32xf32>
    %67 = vector.broadcast %63 : vector<4x1x32xf32> to vector<4x16x32xf32>
    %68 = arith.mulf %66, %67 : vector<4x16x32xf32>
    %cst_11 = arith.constant 1.000000e+00 : f32
    %69 = vector.broadcast %cst_11 : f32 to vector<4x16x32xf32>
    %70 = arith.subf %69, %68 : vector<4x16x32xf32>
    %71 = vector.broadcast %61 : vector<4x16x1xf32> to vector<4x16x32xf32>
    %72 = vector.broadcast %65 : vector<4x1x32xf32> to vector<4x16x32xf32>
    %73 = arith.mulf %71, %72 : vector<4x16x32xf32>
    %74 = vector.extract_strided_slice %24 {offsets = [16, 0], sizes = [4, 16], strides = [1, 1]} : vector<32x16xf32> to vector<4x16xf32>
    %75 = vector.shape_cast %74 : vector<4x16xf32> to vector<4x16x1xf32>
    %76 = vector.extract_strided_slice %12 {offsets = [16, 0], sizes = [4, 32], strides = [1, 1]} : vector<32x32xf32> to vector<4x32xf32>
    %77 = vector.shape_cast %76 : vector<4x32xf32> to vector<4x1x32xf32>
    %78 = vector.extract_strided_slice %14 {offsets = [16, 0], sizes = [4, 32], strides = [1, 1]} : vector<32x32xf32> to vector<4x32xf32>
    %79 = vector.shape_cast %78 : vector<4x32xf32> to vector<4x1x32xf32>
    %80 = vector.broadcast %75 : vector<4x16x1xf32> to vector<4x16x32xf32>
    %81 = vector.broadcast %77 : vector<4x1x32xf32> to vector<4x16x32xf32>
    %82 = arith.mulf %80, %81 : vector<4x16x32xf32>
    %cst_12 = arith.constant 1.000000e+00 : f32
    %83 = vector.broadcast %cst_12 : f32 to vector<4x16x32xf32>
    %84 = arith.subf %83, %82 : vector<4x16x32xf32>
    %85 = vector.broadcast %75 : vector<4x16x1xf32> to vector<4x16x32xf32>
    %86 = vector.broadcast %79 : vector<4x1x32xf32> to vector<4x16x32xf32>
    %87 = arith.mulf %85, %86 : vector<4x16x32xf32>
    %88 = vector.extract_strided_slice %24 {offsets = [20, 0], sizes = [4, 16], strides = [1, 1]} : vector<32x16xf32> to vector<4x16xf32>
    %89 = vector.shape_cast %88 : vector<4x16xf32> to vector<4x16x1xf32>
    %90 = vector.extract_strided_slice %12 {offsets = [20, 0], sizes = [4, 32], strides = [1, 1]} : vector<32x32xf32> to vector<4x32xf32>
    %91 = vector.shape_cast %90 : vector<4x32xf32> to vector<4x1x32xf32>
    %92 = vector.extract_strided_slice %14 {offsets = [20, 0], sizes = [4, 32], strides = [1, 1]} : vector<32x32xf32> to vector<4x32xf32>
    %93 = vector.shape_cast %92 : vector<4x32xf32> to vector<4x1x32xf32>
    %94 = vector.broadcast %89 : vector<4x16x1xf32> to vector<4x16x32xf32>
    %95 = vector.broadcast %91 : vector<4x1x32xf32> to vector<4x16x32xf32>
    %96 = arith.mulf %94, %95 : vector<4x16x32xf32>
    %cst_13 = arith.constant 1.000000e+00 : f32
    %97 = vector.broadcast %cst_13 : f32 to vector<4x16x32xf32>
    %98 = arith.subf %97, %96 : vector<4x16x32xf32>
    %99 = vector.broadcast %89 : vector<4x16x1xf32> to vector<4x16x32xf32>
    %100 = vector.broadcast %93 : vector<4x1x32xf32> to vector<4x16x32xf32>
    %101 = arith.mulf %99, %100 : vector<4x16x32xf32>
    %102 = vector.extract_strided_slice %24 {offsets = [24, 0], sizes = [4, 16], strides = [1, 1]} : vector<32x16xf32> to vector<4x16xf32>
    %103 = vector.shape_cast %102 : vector<4x16xf32> to vector<4x16x1xf32>
    %104 = vector.extract_strided_slice %12 {offsets = [24, 0], sizes = [4, 32], strides = [1, 1]} : vector<32x32xf32> to vector<4x32xf32>
    %105 = vector.shape_cast %104 : vector<4x32xf32> to vector<4x1x32xf32>
    %106 = vector.extract_strided_slice %14 {offsets = [24, 0], sizes = [4, 32], strides = [1, 1]} : vector<32x32xf32> to vector<4x32xf32>
    %107 = vector.shape_cast %106 : vector<4x32xf32> to vector<4x1x32xf32>
    %108 = vector.broadcast %103 : vector<4x16x1xf32> to vector<4x16x32xf32>
    %109 = vector.broadcast %105 : vector<4x1x32xf32> to vector<4x16x32xf32>
    %110 = arith.mulf %108, %109 : vector<4x16x32xf32>
    %cst_14 = arith.constant 1.000000e+00 : f32
    %111 = vector.broadcast %cst_14 : f32 to vector<4x16x32xf32>
    %112 = arith.subf %111, %110 : vector<4x16x32xf32>
    %113 = vector.broadcast %103 : vector<4x16x1xf32> to vector<4x16x32xf32>
    %114 = vector.broadcast %107 : vector<4x1x32xf32> to vector<4x16x32xf32>
    %115 = arith.mulf %113, %114 : vector<4x16x32xf32>
    %116 = vector.extract_strided_slice %24 {offsets = [28, 0], sizes = [4, 16], strides = [1, 1]} : vector<32x16xf32> to vector<4x16xf32>
    %117 = vector.shape_cast %116 : vector<4x16xf32> to vector<4x16x1xf32>
    %118 = arith.mulf %42, %31 : vector<4x16x32xf32>
    %119 = arith.addf %118, %45 : vector<4x16x32xf32>
    %120 = arith.mulf %56, %45 : vector<4x16x32xf32>
    %121 = arith.addf %120, %59 : vector<4x16x32xf32>
    %122 = arith.mulf %56, %42 : vector<4x16x32xf32>
    %123 = arith.mulf %70, %59 : vector<4x16x32xf32>
    %124 = arith.addf %123, %73 : vector<4x16x32xf32>
    %125 = arith.mulf %70, %56 : vector<4x16x32xf32>
    %126 = arith.mulf %84, %73 : vector<4x16x32xf32>
    %127 = arith.addf %126, %87 : vector<4x16x32xf32>
    %128 = arith.mulf %84, %70 : vector<4x16x32xf32>
    %129 = arith.mulf %98, %87 : vector<4x16x32xf32>
    %130 = arith.addf %129, %101 : vector<4x16x32xf32>
    %131 = arith.mulf %98, %84 : vector<4x16x32xf32>
    %132 = arith.mulf %112, %101 : vector<4x16x32xf32>
    %133 = arith.addf %132, %115 : vector<4x16x32xf32>
    %134 = arith.mulf %112, %98 : vector<4x16x32xf32>
    %135 = arith.mulf %122, %31 : vector<4x16x32xf32>
    %136 = arith.addf %135, %121 : vector<4x16x32xf32>
    %137 = arith.mulf %125, %119 : vector<4x16x32xf32>
    %138 = arith.addf %137, %124 : vector<4x16x32xf32>
    %139 = arith.mulf %128, %121 : vector<4x16x32xf32>
    %140 = arith.addf %139, %127 : vector<4x16x32xf32>
    %141 = arith.mulf %128, %122 : vector<4x16x32xf32>
    %142 = arith.mulf %131, %124 : vector<4x16x32xf32>
    %143 = arith.addf %142, %130 : vector<4x16x32xf32>
    %144 = arith.mulf %131, %125 : vector<4x16x32xf32>
    %145 = arith.mulf %134, %127 : vector<4x16x32xf32>
    %146 = arith.addf %145, %133 : vector<4x16x32xf32>
    %147 = arith.mulf %134, %128 : vector<4x16x32xf32>
    %148 = arith.mulf %141, %31 : vector<4x16x32xf32>
    %149 = arith.addf %148, %140 : vector<4x16x32xf32>
    %150 = arith.mulf %144, %119 : vector<4x16x32xf32>
    %151 = arith.addf %150, %143 : vector<4x16x32xf32>
    %152 = arith.mulf %147, %136 : vector<4x16x32xf32>
    %153 = arith.addf %152, %146 : vector<4x16x32xf32>
    %cst_15 = arith.constant 0.000000e+00 : f32
    %154 = vector.broadcast %cst_15 : f32 to vector<4x32xf32>
    %155 = vector.broadcast %33 : vector<4x16x1xf32> to vector<4x16x32xf32>
    %156 = arith.mulf %31, %155 : vector<4x16x32xf32>
    %cst_16 = arith.constant dense<0.000000e+00> : vector<4x32xf32>
    %157 = vector.multi_reduction <add>, %156, %cst_16 [1] : vector<4x16x32xf32> to vector<4x32xf32>
    %158 = vector.broadcast %47 : vector<4x16x1xf32> to vector<4x16x32xf32>
    %159 = arith.mulf %119, %158 : vector<4x16x32xf32>
    %cst_17 = arith.constant dense<0.000000e+00> : vector<4x32xf32>
    %160 = vector.multi_reduction <add>, %159, %cst_17 [1] : vector<4x16x32xf32> to vector<4x32xf32>
    %161 = vector.broadcast %61 : vector<4x16x1xf32> to vector<4x16x32xf32>
    %162 = arith.mulf %136, %161 : vector<4x16x32xf32>
    %cst_18 = arith.constant dense<0.000000e+00> : vector<4x32xf32>
    %163 = vector.multi_reduction <add>, %162, %cst_18 [1] : vector<4x16x32xf32> to vector<4x32xf32>
    %164 = vector.broadcast %75 : vector<4x16x1xf32> to vector<4x16x32xf32>
    %165 = arith.mulf %138, %164 : vector<4x16x32xf32>
    %cst_19 = arith.constant dense<0.000000e+00> : vector<4x32xf32>
    %166 = vector.multi_reduction <add>, %165, %cst_19 [1] : vector<4x16x32xf32> to vector<4x32xf32>
    %167 = vector.broadcast %89 : vector<4x16x1xf32> to vector<4x16x32xf32>
    %168 = arith.mulf %149, %167 : vector<4x16x32xf32>
    %cst_20 = arith.constant dense<0.000000e+00> : vector<4x32xf32>
    %169 = vector.multi_reduction <add>, %168, %cst_20 [1] : vector<4x16x32xf32> to vector<4x32xf32>
    %170 = vector.broadcast %103 : vector<4x16x1xf32> to vector<4x16x32xf32>
    %171 = arith.mulf %151, %170 : vector<4x16x32xf32>
    %cst_21 = arith.constant dense<0.000000e+00> : vector<4x32xf32>
    %172 = vector.multi_reduction <add>, %171, %cst_21 [1] : vector<4x16x32xf32> to vector<4x32xf32>
    %173 = vector.broadcast %117 : vector<4x16x1xf32> to vector<4x16x32xf32>
    %174 = arith.mulf %153, %173 : vector<4x16x32xf32>
    %cst_22 = arith.constant dense<0.000000e+00> : vector<4x32xf32>
    %175 = vector.multi_reduction <add>, %174, %cst_22 [1] : vector<4x16x32xf32> to vector<4x32xf32>
    %176 = tpu.concatenate %154, %157, %160, %163, %166, %169, %172, %175 in 0 : vector<4x32xf32>, vector<4x32xf32>, vector<4x32xf32>, vector<4x32xf32>, vector<4x32xf32>, vector<4x32xf32>, vector<4x32xf32>, vector<4x32xf32> -> vector<32x32xf32>
    %c0_23 = arith.constant 0 : index
    %c0_24 = arith.constant 0 : index
    %177 = vector.load %arg4[%c0_23, %c0_24] : memref<32x32xf32, #tpu.memory_space<vmem>>, vector<32x32xf32>
    %cst_25 = arith.constant dense<0.000000e+00> : vector<32x32xf32>
    %178 = tpu.matmul %176, %177, %cst_25 {dimension_numbers = #tpu.dot_dimension_numbers<[1], [0], [0], [1], [0, 0, 1, 1], [], []>} : vector<32x32xf32>, vector<32x32xf32>, vector<32x32xf32> -> vector<32x32xf32>
    %179 = arith.addf %6, %178 : vector<32x32xf32>
    %180 = math.tanh %179 : vector<32x32xf32>
    %c0_26 = arith.constant 0 : index
    %c0_27 = arith.constant 0 : index
    %181 = vector.load %arg5[%c0_26, %c0_27] : memref<32x1xf32, #tpu.memory_space<vmem>>, vector<32x1xf32>
    %cst_28 = arith.constant dense<0.000000e+00> : vector<32x1xf32>
    %182 = tpu.matmul %180, %181, %cst_28 {dimension_numbers = #tpu.dot_dimension_numbers<[1], [0], [0], [1], [0, 0, 1, 1], [], []>} : vector<32x32xf32>, vector<32x1xf32>, vector<32x1xf32> -> vector<32x1xf32>
    %c0_29 = arith.constant 0 : index
    %c0_30 = arith.constant 0 : index
    %183 = memref.load %arg6[%c0_29, %c0_30] : memref<1x1xf32, #tpu.memory_space<smem>>
    %184 = vector.broadcast %183 : f32 to vector<32x1xf32>
    %185 = arith.addf %182, %184 : vector<32x1xf32>
    %186 = arith.negf %185 : vector<32x1xf32>
    %187 = math.exp %186 : vector<32x1xf32>
    %cst_31 = arith.constant 1.000000e+00 : f32
    %188 = vector.broadcast %cst_31 : f32 to vector<32x1xf32>
    %189 = arith.addf %188, %187 : vector<32x1xf32>
    %190 = arith.divf %188, %189 : vector<32x1xf32>
    %c0_32 = arith.constant 0 : index
    %c0_33 = arith.constant 0 : index
    %191 = vector.load %arg7[%c0_32, %c0_33] : memref<32x1xf32, #tpu.memory_space<vmem>>, vector<32x1xf32>
    tpu.vector_store %arg7[%c0_32, %c0_33], %190 {strides = array<i32>} : memref<32x1xf32, #tpu.memory_space<vmem>>, vector<32x1xf32>,
    return
  }
  func.func @transform_0(%arg0: i32) -> (i32, i32) {
    %c0_i32 = arith.constant 0 : i32
    %c0_i32_0 = arith.constant 0 : i32
    %c0_i32_1 = arith.constant 0 : i32
    return %c0_i32, %c0_i32_0 : i32, i32
  }
  func.func @transform_1(%arg0: i32) -> (i32, i32) {
    %c0_i32 = arith.constant 0 : i32
    %c0_i32_0 = arith.constant 0 : i32
    %c0_i32_1 = arith.constant 0 : i32
    return %c0_i32, %c0_i32_0 : i32, i32
  }
  func.func @transform_2(%arg0: i32) -> (i32, i32) {
    %c0_i32 = arith.constant 0 : i32
    %c0_i32_0 = arith.constant 0 : i32
    %c0_i32_1 = arith.constant 0 : i32
    return %c0_i32, %c0_i32_0 : i32, i32
  }
  func.func @transform_3(%arg0: i32) -> (i32, i32) {
    %c0_i32 = arith.constant 0 : i32
    %c0_i32_0 = arith.constant 0 : i32
    %c0_i32_1 = arith.constant 0 : i32
    return %c0_i32, %c0_i32_0 : i32, i32
  }
  func.func @transform_4(%arg0: i32) -> (i32, i32) {
    %c0_i32 = arith.constant 0 : i32
    %c0_i32_0 = arith.constant 0 : i32
    %c0_i32_1 = arith.constant 0 : i32
    return %c0_i32, %c0_i32_0 : i32, i32
  }
  func.func @transform_5(%arg0: i32) -> (i32, i32) {
    %c0_i32 = arith.constant 0 : i32
    %c0_i32_0 = arith.constant 0 : i32
    %c0_i32_1 = arith.constant 0 : i32
    return %c0_i32, %c0_i32_0 : i32, i32
  }
  func.func @transform_6(%arg0: i32) -> (i32, i32) {
    %c0_i32 = arith.constant 0 : i32
    %c0_i32_0 = arith.constant 0 : i32
    %c0_i32_1 = arith.constant 0 : i32
    return %c0_i32, %c0_i32_0 : i32, i32
  }
}

</mosaic_0001>

<bundles_post_ra>
// kernel: dkt_forward.1
= control target key start
LH: loop header
LB: loop body
LE: loop exit
PB: predicated region body
PF: predicated region fallthrough
CT: control target
= control target key end

     0   :  { %vm31_vm0 = vcmask 138240   ;;  %vm44_vm1 = vcmask 1040384   ;;  %v2662_v60 = vmov 0.0   ;;  %vm169_vm2 = vcmask 531456   ;;  %s4392_s1 = inlined_call_operand.vmem [shape: f32[17,65], index: 1, kind: input, shape index: {}]   ;;  %s4393_s0 = inlined_call_operand.vmem [shape: f32[32,17], index: 0, kind: input, shape index: {}]   ;;  %s4394_s2 = inlined_call_operand.vmem [shape: f32[65,512], index: 2, kind: input, shape index: {}]   ;;  %s4395_s3 = inlined_call_operand.vmem [shape: f32[32,32], index: 3, kind: input, shape index: {}]   ;;  %s4396_s4 = inlined_call_operand.vmem [shape: f32[32,1], index: 4, kind: input, shape index: {}]   ;;  %s4397_s5 = inlined_call_operand.<no memory space> [shape: f32[1,1], index: 5, kind: input, shape index: {}]   ;;  %s4398_s6 = inlined_call_operand.vmem [shape: f32[32,1], index: 6, kind: output, shape index: {}]  }
   0x1   :  { %v28_v0 = vld [vmem:[%s4392_s1] sm:$0xff]  ;;  %v29_v1 = vld [vmem:[%s4392_s1 + $0x8] sm:$0xff]  ;;  %v30_v4 = vld [vmem:[%s4392_s1 + $0x10] sm:$0x1]  ;;  %258 = vmatprep.mubr.f32.mxu1 %v2662_v60  ;;  %vm400_vm3 = vcmask 130048   ;;  %vm1831_vm4 = vcmask 261120  }
   0x2   :  { %v2540_v2 = vpack.c.bf16 %v29_v1, %v28_v0  ;;  %v24_v3 = vld [vmem:[%s4393_s0] sm:$0xff]  ;;  %v134_v5 = vld [vmem:[%s4394_s2 + $0x8] sm:$0xff]  ;;  %v136_v8 = vld [vmem:[%s4394_s2 + $0x18] sm:$0xff]  ;;  %vm2136_vm5 = vcmask 1045509   ;;  %vm2138_vm6 = vcmask 1046534   ;;  %vm2140_vm7 = vcmask 1047559  }
   0x3   :  { %2506 = vmatprep.mubr.msk.f32.mxu0 %vm31_vm0, %v24_v3  ;;  %v138_v6 = vld [vmem:[%s4394_s2 + $0x28] sm:$0xff]  ;;  %v140_v9 = vld [vmem:[%s4394_s2 + $0x38] sm:$0xff]  ;;  %v133_v10 = vld [vmem:[%s4394_s2] sm:$0xff]  ;;  %vm2194_vm8 = vcmask 1043456   ;;  %vm2147_vm9 = vcmask 1041409   ;;  %vm2149_vm10 = vcmask 1042434  }
   0x4   :  { %2541 = vmatprep.subr.bf16.mxu0 %v2540_v2  ;;  %v2544_v7 = vpack.c.bf16 %v138_v6, %v134_v5  ;;  %v25_v11 = vld [vmem:[%s4393_s0 + $0x8] sm:$0xff]  ;;  %v137_v12 = vld [vmem:[%s4394_s2 + $0x20] sm:$0xff]  ;;  %v135_v13 = vld [vmem:[%s4394_s2 + $0x10] sm:$0xff]  ;;  %v2560_v16 = vpack.c.bf16 %v140_v9, %v136_v8  ;;  %vm2151_vm11 = vcmask 1043459   ;;  %vm2435_vm12 = vcmask 7168  }
   0x5   :  { %2543 = vmatpush3.bf16.msra.mxu0 %v2540_v2  ;;  %v139_v14 = vld [vmem:[%s4394_s2 + $0x30] sm:$0xff]  ;;  %v2546_v17 = vpack.c.bf16 %v137_v12, %v133_v10  ;;  %v142_v18 = vld [vmem:[%s4394_s2 + $0x48] sm:$0xff]  ;;  %v144_v20 = vld [vmem:[%s4394_s2 + $0x58] sm:$0xff] }
   0x6   :  { %2504 = vmatprep.subr.msk.mxu0 %vm44_vm1, %v30_v4  ;;  %v26_v15 = vld [vmem:[%s4393_s0 + $0x10] sm:$0xff]  ;;  %2545 = vmatprep.subr.bf16.mxu1 %v2544_v7  ;;  %v146_v19 = vld [vmem:[%s4394_s2 + $0x68] sm:$0xff]  ;;  %v2562_v21 = vpack.c.bf16 %v139_v14, %v135_v13  ;;  %v148_v23 = vld [vmem:[%s4394_s2 + $0x78] sm:$0xff] }
   0x7   :  { %v2548_v22 = vpack.c.bf16 %v146_v19, %v142_v18  ;;  %v141_v24 = vld [vmem:[%s4394_s2 + $0x40] sm:$0xff]  ;;  %2547 = vmatpush1.bf16.msra.mxu1 %v2546_v17  ;;  %v2564_v26 = vpack.c.bf16 %v148_v23, %v144_v20  ;;  %v143_v28 = vld [vmem:[%s4394_s2 + $0x50] sm:$0xff]  ;;  %v150_v30 = vld [vmem:[%s4394_s2 + $0x88] sm:$0xff]  ;;  %v445_v20 = vlaneseq }
   0x8   :  { %v145_v25 = vld [vmem:[%s4394_s2 + $0x60] sm:$0xff]  ;;  %v147_v29 = vld [vmem:[%s4394_s2 + $0x70] sm:$0xff]  ;;  %v154_v31 = vld [vmem:[%s4394_s2 + $0xa8] sm:$0xff] }
   0x9   :  { %v2550_v27 = vpack.c.bf16 %v145_v25, %v141_v24  ;;  %2505 = vmatpush3.msk.msra.mxu0 %vm44_vm1, %v30_v4  ;;  %2549 = vmatprep.subr.bf16.mxu1 %v2548_v22  ;;  %v152_v32 = vld [vmem:[%s4394_s2 + $0x98] sm:$0xff]  ;;  %v2552_v34 = vpack.c.bf16 %v154_v31, %v150_v30  ;;  %v149_v35 = vld [vmem:[%s4394_s2 + $0x80] sm:$0xff]  ;;  %v2566_v38 = vpack.c.bf16 %v147_v29, %v143_v28  ;;  %v158_v39 = vld [vmem:[%s4394_s2 + $0xc8] sm:$0xff]  ;;  %v2876_v29 = vshrl.u32 %v445_v20, 7 }
   0xa   :  { %v156_v33 = vld [vmem:[%s4394_s2 + $0xb8] sm:$0xff]  ;;  %2507 = vmatmul.mubr.msk.f32.vlgmr.msra.gmra.mrb[0].mxu0 %vm31_vm0, %v25_v11  ;;  %2561 = vmatprep.subr.bf16.mxu0 %v2560_v16  ;;  %v153_v36 = vld [vmem:[%s4394_s2 + $0xa0] sm:$0xff]  ;;  %v162_v40 = vld [vmem:[%s4394_s2 + $0xe8] sm:$0xff] }
   0xb   :  { %2509 = vmatprep.mubr.msk.f32.mxu0 %vm31_vm0, %v26_v15  ;;  %v27_v37 = vld [vmem:[%s4393_s0 + $0x18] sm:$0xff]  ;;  %2563 = vmatpush1.bf16.msra.mxu0 %v2562_v21  ;;  %v2568_v41 = vpack.c.bf16 %v156_v33, %v152_v32  ;;  %v2554_v42 = vpack.c.bf16 %v153_v36, %v149_v35  ;;  %v151_v43 = vld [vmem:[%s4394_s2 + $0x90] sm:$0xff]  ;;  %v2556_v46 = vpack.c.bf16 %v162_v40, %v158_v39  ;;  %v157_v48 = vld [vmem:[%s4394_s2 + $0xc0] sm:$0xff]  ;;  %v2663_v21 = vmov 1966171168  }
   0xc   :  { %2565 = vmatprep.subr.bf16.mxu0 %v2564_v26  ;;  %2551 = vmatpush1.bf16.msra.mxu1 %v2550_v27  ;;  %v155_v44 = vld [vmem:[%s4394_s2 + $0xb0] sm:$0xff]  ;;  %v160_v45 = vld [vmem:[%s4394_s2 + $0xd8] sm:$0xff]  ;;  %v161_v49 = vld [vmem:[%s4394_s2 + $0xe0] sm:$0xff]  ;;  %v491_v22 = vunpack.c.l.s4 %v2663_v21 }
   0xd   :  { %2553 = vmatprep.subr.bf16.mxu1 %v2552_v34  ;;  %v164_v47 = vld [vmem:[%s4394_s2 + $0xf8] sm:$0xff]  ;;  %v2570_v50 = vpack.c.bf16 %v155_v44, %v151_v43  ;;  %v2558_v52 = vpack.c.bf16 %v161_v49, %v157_v48  ;;  %v159_v53 = vld [vmem:[%s4394_s2 + $0xd0] sm:$0xff]  ;;  %v166_v56 = vld [vmem:[%s4394_s2 + $0x108] sm:$0x1] }
   0xe   :  { %2510 = vmatmul.mubr.msk.f32.gmra.mrb[2].mxu0 %vm31_vm0, %v27_v37  ;;  %v2572_v51 = vpack.c.bf16 %v164_v47, %v160_v45  ;;  %v163_v54 = vld [vmem:[%s4394_s2 + $0xf0] sm:$0xff]  ;;  %v168_v57 = vld [vmem:[%s4394_s2 + $0x118] sm:$0x1]  ;;  %v165_v58 = vld [vmem:[%s4394_s2 + $0x100] sm:$0x1]  ;;  %v492_v30 = vunpack.c.0.s8 %v491_v22 }
   0xf   :  { %2567 = vmatpush1.bf16.msra.mxu0 %v2566_v38  ;;  %v2574_v55 = vpack.c.bf16 %v163_v54, %v159_v53  ;;  %v167_v59 = vld [vmem:[%s4394_s2 + $0x110] sm:$0x1]  ;;  %347 = vmatprep.mubr.f32.mxu0 %v2662_v60 }
  0x10   :  { %2569 = vmatprep.subr.bf16.mxu0 %v2568_v41  ;;  %2555 = vmatpush1.bf16.msra.mxu1 %v2554_v42  ;;  %v2881_v35 = vsub.s32 %v492_v30, %v2876_v29 }
  0x11   :  { %2557 = vmatprep.subr.bf16.mxu1 %v2556_v46 }
  0x13   :  { %2571 = vmatpush1.bf16.msra.mxu0 %v2570_v50 }
  0x14   :  { %2573 = vmatprep.subr.bf16.mxu0 %v2572_v51  ;;  %2559 = vmatpush1.bf16.msra.mxu1 %v2558_v52 }
  0x15   :  { %2449 = vmatprep.subr.msk.mxu1 %vm44_vm1, %v166_v56 }
  0x17   :  { %2575 = vmatpush1.bf16.msra.mxu0 %v2574_v55 }
  0x18   :  { %2455 = vmatprep.subr.msk.mxu0 %vm44_vm1, %v168_v57  ;;  %2450 = vmatpush1.msk.msra.mxu1 %vm44_vm1, %v165_v58 }
  0x1b   :  { %2456 = vmatpush1.msk.msra.mxu0 %vm44_vm1, %v167_v59 }
  0xdd   :  { %v2508_v61 = vpop.f32.mrb[0].mxu0 }
  0xde   :  { %v114_v62 = vpop.f32.mrb[1].mxu0 }
  0xdf   :  { %2451 = vmatmul.mubr.msk.f32.vlgmr.msra.gmra.mrb[0].mxu1 %vm169_vm2, %v114_v62  ;;  %2457 = vmatmul.mubr.msk.f32.vlgmr.msra.gmra.mrb[4].mxu0 %vm169_vm2, %v114_v62 }
  0xe0   :  { %264 = vmatprep.mubr.f32.mxu1 %v2662_v60  ;;  %353 = vmatprep.mubr.f32.mxu0 %v2662_v60 }
  0xe1   :  { %v2511_v63 = vpop.f32.mrb[2].mxu0 }
  0xe2   :  { %v124_v0 = vpop.f32.mrb[3].mxu0 }
  0xe3   :  { %2452 = vmatmul.mubr.msk.f32.gmra.mrb[2].mxu1 %vm169_vm2, %v2508_v61  ;;  %2458 = vmatmul.mubr.msk.f32.gmra.mrb[6].mxu0 %vm169_vm2, %v2508_v61 }
  0xe4   :  { %270 = vmatprep.mubr.f32.mxu1 %v2662_v60  ;;  %359 = vmatprep.mubr.f32.mxu0 %v2662_v60 }
  0xe7   :  { %2453 = vmatmul.mubr.msk.f32.gmra.mrb[4].mxu1 %vm169_vm2, %v124_v0  ;;  %2459 = vmatmul.mubr.msk.f32.gmra.mrb[8].mxu0 %vm169_vm2, %v124_v0 }
  0xe8   :  { %276 = vmatprep.mubr.f32.mxu1 %v2662_v60  ;;  %365 = vmatprep.mubr.f32.mxu0 %v2662_v60 }
  0xeb   :  { %2454 = vmatmul.mubr.msk.f32.gmra.mrb[6].mxu1 %vm169_vm2, %v2511_v63  ;;  %2460 = vmatmul.mubr.msk.f32.gmra.mrb[10].mxu0 %vm169_vm2, %v2511_v63 }
 0x1b2   :  { %v2846_v1 = vpop.f32.mrb[0].mxu1  ;;  %v2848_v2 = vpop.f32.mrb[4].mxu0 }
 0x1b3   :  { %v2850_v3 = vpop.f32.mrb[1].mxu1  ;;  %v2852_v4 = vpop.f32.mrb[5].mxu0  ;;  %v401_v13 = vsel %vm400_vm3, %v2846_v1, -inf }
 0x1b4   :  { %4513 = vst [vmem:[#allocation3_spill] sm:$0xff] %v2850_v3 }
 0x1b6   :  { %v2854_v5 = vpop.f32.mrb[2].mxu1  ;;  %v355_v6 = vpop.f32.mrb[6].mxu0 }
 0x1b7   :  { %v2462_v7 = vmul.f32 -1.442695, %v355_v6  ;;  %v2856_v8 = vpop.f32.mrb[3].mxu1  ;;  %v357_v9 = vpop.f32.mrb[7].mxu0  ;;  %v404_v10 = vsel %vm400_vm3, %v2854_v5, -inf }
 0x1b8   :  { %4514 = vst [vmem:[#allocation4_spill] sm:$0xff] %v2856_v8  ;;  %2598 = vtanh.f32 %v357_v9  ;;  %405 = vmax.xlane.f32.xlu0 %v404_v10 }
 0x1b9   :  { %2600 = vpow2.f32 %v2462_v7 }
 0x1ba   :  { %v2860_v11 = vpop.f32.mrb[4].mxu1  ;;  %v361_v12 = vpop.f32.mrb[8].mxu0 }
 0x1bb   :  { %v407_v14 = vsel %vm400_vm3, %v2860_v11, -inf  ;;  %v2866_v15 = vpop.f32.mrb[5].mxu1  ;;  %v2463_v16 = vmul.f32 -1.442695, %v361_v12  ;;  %v363_v17 = vpop.f32.mrb[9].mxu0 }
 0x1bc   :  { %4515 = vst [vmem:[#allocation5_spill] sm:$0xff] %v2866_v15  ;;  %402 = vmax.xlane.f32.xlu0 %v401_v13  ;;  %408 = vmax.xlane.f32.xlu1 %v407_v14  ;;  %2602 = vtanh.f32 %v363_v17 }
 0x1bd   :  { %2604 = vpow2.f32 %v2463_v16 }
 0x1be   :  { %v2868_v18 = vpop.f32.mrb[6].mxu1  ;;  %v367_v19 = vpop.f32.mrb[10].mxu0 }
 0x1bf   :  { %v410_v23 = vsel %vm400_vm3, %v2868_v18, -inf  ;;  %v2464_v24 = vmul.f32 -1.442695, %v367_v19  ;;  %v2872_v25 = vpop.f32.mrb[7].mxu1  ;;  %v369_v26 = vpop.f32.mrb[11].mxu0 }
 0x1c0   :  { %4516 = vst [vmem:[#allocation6_spill] sm:$0xff] %v2872_v25  ;;  %411 = vmax.xlane.f32.xlu1 %v410_v23 }
 0x1c1   :  { %2606 = vpow2.f32 %v2464_v24 }
 0x1c2   :  { %v2874_v27 = vpop.eup %2598 }
 0x1c3   :  { %v2601_v28 = vpop.eup %2600  ;;  %v928_v32 = vcombine.high %v2874_v27, %v2874_v27 }
 0x1c4   :  { %v385_v31 = vadd.f32 1.0, %v2601_v28 }
 0x1c5   :  { %v935_v37 = vrot.slane %v928_v32, %v2881_v35 }
 0x1c6   :  { %v2603_v33 = vpop.eup %2602  ;;  %2608 = vrcp.f32 %v385_v31 }
 0x1c7   :  { %v2605_v34 = vpop.eup %2604  ;;  %v1093_v38 = vrot.slane %v2603_v33, %v2881_v35  ;;  %v1244_v39 = vcombine.high %v2603_v33, %v2603_v33  ;;  %v2886_v41 = vrot.slane %v935_v37, %v2881_v35  ;;  %v936_v42 = vcombine.high %v935_v37, %v935_v37 }
 0x1c8   :  { %v386_v36 = vadd.f32 1.0, %v2605_v34 }
 0x1c9   :  { %v2889_v43 = vrot.slane %v1093_v38, %v2881_v35  ;;  %v1094_v44 = vcombine.high %v1093_v38, %v1093_v38  ;;  %v1251_v45 = vrot.slane %v1244_v39, %v2881_v35  ;;  %v2893_v46 = vrot.slane %v936_v42, %v2881_v35 }
 0x1ca   :  { %2610 = vrcp.f32 %v386_v36 }
 0x1cb   :  { %v2607_v40 = vpop.eup %2606  ;;  %v2896_v48 = vrot.slane %v1094_v44, %v2881_v35  ;;  %v2901_v50 = vrot.slane %v1251_v45, %v2881_v35  ;;  %2612 = vtanh.f32 %v369_v26  ;;  %v1252_v54 = vcombine.high %v1251_v45, %v1251_v45 }
 0x1cc   :  { %v387_v47 = vadd.f32 1.0, %v2607_v40 }
 0x1cd   :  { %v2911_v59 = vrot.slane %v1252_v54, %v2881_v35  ;;  %v2962_v54 = vsub.s32 5, %v2876_v29 }
 0x1ce   :  { %2614 = vrcp.f32 %v387_v47 }
 0x1d0   :  { %v2898_v49 = vpop.eup %2608 }
 0x1d1   :  { %v903_v51 = vcombine.high %v2898_v49, %v2898_v49 }
 0x1d3   :  { %v910_v53 = vrot.slane %v903_v51, %v2881_v35 }
 0x1d4   :  { %v2611_v52 = vpop.eup %2610 }
 0x1d5   :  { %v2907_v55 = vrot.slane %v910_v53, %v2881_v35  ;;  %v911_v56 = vcombine.high %v910_v53, %v910_v53  ;;  %v1068_v57 = vrot.slane %v2611_v52, %v2881_v35  ;;  %v1219_v58 = vcombine.high %v2611_v52, %v2611_v52  ;;  %v2613_v0 = vpop.eup %2612 }
 0x1d6   :  { %v1409_v14 = vrot.slane %v2613_v0, %v2881_v35  ;;  %v2958_v52 = vsub.s32 4, %v2876_v29 }
 0x1d7   :  { %v2914_v60 = vrot.slane %v911_v56, %v2881_v35  ;;  %v2917_v61 = vrot.slane %v1068_v57, %v2881_v35  ;;  %v1069_v62 = vcombine.high %v1068_v57, %v1068_v57  ;;  %v1226_v63 = vrot.slane %v1219_v58, %v2881_v35 }
 0x1d8   :  { %v2615_v7 = vpop.eup %2614  ;;  %v2935_v17 = vrot.slane %v1409_v14, %v2881_v35  ;;  %v1410_v20 = vcombine.high %v1409_v14, %v1409_v14  ;;  %v2966_v57 = vsub.s32 6, %v2876_v29 }
 0x1d9   :  { %v2921_v6 = vrot.slane %v1069_v62, %v2881_v35  ;;  %v2924_v9 = vrot.slane %v1226_v63, %v2881_v35  ;;  %v1227_v10 = vcombine.high %v1226_v63, %v1226_v63  ;;  %v1384_v13 = vrot.slane %v2615_v7, %v2881_v35 }
 0x1da   :  { %v2941_v22 = vrot.slane %v1410_v20, %v2881_v35  ;;  %v2970_v62 = vsub.s32 7, %v2876_v29  ;;  %v2974_v7 = vsub.s32 0, %v2876_v29 }
 0x1db   :  { %v2927_v12 = vrot.slane %v1227_v10, %v2881_v35  ;;  %v2932_v16 = vrot.slane %v1384_v13, %v2881_v35  ;;  %v1385_v19 = vcombine.high %v1384_v13, %v1384_v13  ;;  %v2978_v13 = vsub.s32 1, %v2876_v29 }
 0x1dc   :  { %v3199_v25 = vrot.slane %v2907_v55, %v2974_v7  ;;  %v3203_v3 = vrot.slane %v2914_v60, %v2974_v7 }
 0x1dd   :  { %v2938_v21 = vrot.slane %v1385_v19, %v2881_v35  ;;  %v2982_v19 = vsub.s32 2, %v2876_v29 }
 0x245   :  { %v406_v23 = vpop.xlane.xlu0 %405 }
 0x246   :  { %v414_v24 = vsub.f32 %v2854_v5, %v406_v23 }
 0x248   :  { %v419_v26 = vmul.f32 1.442695, %v414_v24  ;;  %v2986_v24 = vsub.s32 3, %v2876_v29 }
 0x249   :  { %v403_v28 = vpop.xlane.xlu0 %402  ;;  %v409_v30 = vpop.xlane.xlu1 %408 }
 0x24a   :  { %2616 = vpow2.f32 %v419_v26  ;;  %v413_v31 = vsub.f32 %v2846_v1, %v403_v28  ;;  %v415_v32 = vsub.f32 %v2860_v11, %v409_v30 }
 0x24c   :  { %v417_v33 = vmul.f32 1.442695, %v413_v31  ;;  %v421_v34 = vmul.f32 1.442695, %v415_v32 }
 0x24d   :  { %v412_v36 = vpop.xlane.xlu1 %411 }
 0x24e   :  { %2618 = vpow2.f32 %v417_v33  ;;  %v416_v37 = vsub.f32 %v2868_v18, %v412_v36 }
 0x24f   :  { %2620 = vpow2.f32 %v421_v34 }
 0x250   :  { %v423_v38 = vmul.f32 1.442695, %v416_v37 }
 0x252   :  { %2622 = vpow2.f32 %v423_v38 }
 0x254   :  { %v2617_v39 = vpop.eup %2616 }
 0x255   :  { %v428_v5 = vsel %vm400_vm3, %v2617_v39, 0.0 }
 0x256   :  { %429 = vadd.xlane.f32.xlu0 %v428_v5 }
 0x258   :  { %v2619_v40 = vpop.eup %2618 }
 0x259   :  { %v2948_v42 = vpop.eup %2620  ;;  %v425_v1 = vsel %vm400_vm3, %v2619_v40, 0.0 }
 0x25a   :  { %v431_v11 = vsel %vm400_vm3, %v2948_v42, 0.0  ;;  %426 = vadd.xlane.f32.xlu1 %v425_v1 }
 0x25b   :  { %432 = vadd.xlane.f32.xlu0 %v431_v11 }
 0x25c   :  { %v2953_v44 = vpop.eup %2622 }
 0x25d   :  { %v434_v18 = vsel %vm400_vm3, %v2953_v44, 0.0 }
 0x25e   :  { %435 = vadd.xlane.f32.xlu1 %v434_v18  ;;  %v2461_v18 = vmul.f32 -1.442695, %v2848_v2 }
 0x2e3   :  { %v430_v63 = vpop.xlane.xlu0 %429 }
 0x2e7   :  { %v427_v45 = vpop.xlane.xlu1 %426 }
 0x2e8   :  { %2624 = vrcp.f32 %v427_v45  ;;  %v433_v33 = vpop.xlane.xlu0 %432 }
 0x2e9   :  { %2626 = vrcp.f32 %v430_v63 }
 0x2ea   :  { %2628 = vrcp.f32 %v433_v33 }
 0x2eb   :  { %v436_v45 = vpop.xlane.xlu1 %435  ;;  %2630 = vpow2.f32 %v2461_v18 }
 0x2ec   :  { %2632 = vrcp.f32 %v436_v45 }
 0x2ed   :  { %2634 = vtanh.f32 %v2852_v4 }
 0x2f2   :  { %v2625_v47 = vpop.eup %2624 }
 0x2f3   :  { %v441_v51 = vmul.f32 %v2625_v47, %v2619_v40  ;;  %v2627_v23 = vpop.eup %2626 }
 0x2f4   :  { %v442_v26 = vmul.f32 %v2627_v23, %v2617_v39  ;;  %v2629_v38 = vpop.eup %2628 }
 0x2f5   :  { %v545_v53 = vrot.slane %v441_v51, %v2958_v52  ;;  %v556_v56 = vrot.slane %v441_v51, %v2962_v54  ;;  %v567_v58 = vrot.slane %v441_v51, %v2966_v57  ;;  %v578_v0 = vrot.slane %v441_v51, %v2970_v62  ;;  %v2631_v2 = vpop.eup %2630 }
 0x2f6   :  { %v448_v10 = vrot.slane %v441_v51, %v2974_v7  ;;  %v459_v14 = vrot.slane %v441_v51, %v2978_v13  ;;  %v470_v20 = vrot.slane %v441_v51, %v2982_v19  ;;  %v481_v28 = vrot.slane %v441_v51, %v2986_v24 }
 0x2f7   :  { %551 = vbcast.lane.b32.xlu1 %v545_v53, 264  ;;  %547 = vbcast.lane.b32.xlu0 %v545_v53, 256  ;;  %v704_v30 = vrot.slane %v442_v26, %v2974_v7  ;;  %v715_v31 = vrot.slane %v442_v26, %v2978_v13  ;;  %v726_v32 = vrot.slane %v442_v26, %v2982_v19 }
 0x2f8   :  { %v862_v34 = vrot.slane %v442_v26, %v2958_v52  ;;  %v873_v29 = vrot.slane %v442_v26, %v2962_v54  ;;  %v737_v36 = vrot.slane %v442_v26, %v2986_v24  ;;  %v884_v37 = vrot.slane %v442_v26, %v2966_v57 }
 0x2f9   :  { %v443_v39 = vmul.f32 %v2629_v38, %v2948_v42  ;;  %v895_v5 = vrot.slane %v442_v26, %v2970_v62  ;;  %v777_v26 = vrot.slane %v2874_v27, %v2881_v35  ;;  %v2199_v27 = vld [vmem:[%s4395_s3] sm:$0xff] }
 0x2fb   :  { %562 = vbcast.lane.b32.xlu1 %v556_v56, 264  ;;  %558 = vbcast.lane.b32.xlu0 %v556_v56, 256  ;;  %v1020_v40 = vrot.slane %v443_v39, %v2974_v7  ;;  %v1031_v1 = vrot.slane %v443_v39, %v2978_v13  ;;  %v1042_v11 = vrot.slane %v443_v39, %v2982_v19  ;;  %v2633_v56 = vpop.eup %2632 }
 0x2fc   :  { %v1053_v42 = vrot.slane %v443_v39, %v2986_v24  ;;  %v1178_v47 = vrot.slane %v443_v39, %v2958_v52  ;;  %v1189_v51 = vrot.slane %v443_v39, %v2962_v54  ;;  %v1200_v53 = vrot.slane %v443_v39, %v2966_v57 }
 0x2fd   :  { %v3008_v63 = vmul.f32 %v2633_v56, %v2953_v44 }
 0x2ff   :  { %573 = vbcast.lane.b32.xlu1 %v567_v58, 264  ;;  %569 = vbcast.lane.b32.xlu0 %v567_v58, 256  ;;  %v384_v58 = vadd.f32 1.0, %v2631_v2  ;;  %v1336_v4 = vrot.slane %v3008_v63, %v2974_v7 }
 0x301   :  { %2636 = vrcp.f32 %v384_v58 }
 0x303   :  { %584 = vbcast.lane.b32.xlu1 %v578_v0, 264  ;;  %580 = vbcast.lane.b32.xlu0 %v578_v0, 256  ;;  %v1211_v0 = vrot.slane %v443_v39, %v2970_v62  ;;  %v785_v39 = vrot.slane %v777_v26, %v2881_v35 }
 0x305   :  { %v793_v2 = vcombine.high %v785_v39, %v785_v39 }
 0x307   :  { %454 = vbcast.lane.b32.xlu1 %v448_v10, 264  ;;  %450 = vbcast.lane.b32.xlu0 %v448_v10, 256  ;;  %v2635_v10 = vpop.eup %2634 }
 0x308   :  { %v496_v23 = vrot.slane %v2635_v10, %v2881_v35 }
 0x30a   :  { %v504_v33 = vrot.slane %v496_v23, %v2881_v35 }
 0x30b   :  { %465 = vbcast.lane.b32.xlu1 %v459_v14, 264  ;;  %461 = vbcast.lane.b32.xlu0 %v459_v14, 256  ;;  %v612_v14 = vcombine.high %v2635_v10, %v2635_v10 }
 0x30d   :  { %v619_v44 = vrot.slane %v612_v14, %v2881_v35  ;;  %v752_v14 = vrot.slane %v2898_v49, %v2881_v35  ;;  %v3073_v49 = vrot.slane %v793_v2, %v2974_v7 }
 0x30f   :  { %476 = vbcast.lane.b32.xlu1 %v470_v20, 264  ;;  %472 = vbcast.lane.b32.xlu0 %v470_v20, 256  ;;  %v1347_v20 = vrot.slane %v3008_v63, %v2978_v13  ;;  %v778_v13 = vcombine.high %v777_v26, %v777_v26 }
 0x313   :  { %487 = vbcast.lane.b32.xlu1 %v481_v28, 264  ;;  %483 = vbcast.lane.b32.xlu0 %v481_v28, 256  ;;  %v2637_v28 = vpop.eup %2636 }
 0x317   :  { %710 = vbcast.lane.b32.xlu1 %v704_v30, 264  ;;  %706 = vbcast.lane.b32.xlu0 %v704_v30, 256  ;;  %v1358_v30 = vrot.slane %v3008_v63, %v2982_v19  ;;  %v2200_v19 = vld [vmem:[%s4395_s3 + $0x8] sm:$0xff] }
 0x31b   :  { %717 = vbcast.lane.b32.xlu1 %v715_v31, 256  ;;  %728 = vbcast.lane.b32.xlu0 %v726_v32, 256 }
 0x31f   :  { %721 = vbcast.lane.b32.xlu1 %v715_v31, 264  ;;  %864 = vbcast.lane.b32.xlu0 %v862_v34, 256  ;;  %v497_v31 = vcombine.high %v496_v23, %v496_v23  ;;  %v1505_v23 = vrot.slane %v3008_v63, %v2962_v54  ;;  %v3080_v54 = vrot.slane %v2886_v41, %v2974_v7 }
 0x323   :  { %732 = vbcast.lane.b32.xlu1 %v726_v32, 264  ;;  %875 = vbcast.lane.b32.xlu0 %v873_v29, 256  ;;  %v620_v32 = vcombine.high %v619_v44, %v619_v44 }
 0x325   :  { %v634_v38 = vrot.slane %v620_v32, %v2881_v35 }
 0x327   :  { %868 = vbcast.lane.b32.xlu1 %v862_v34, 264  ;;  %739 = vbcast.lane.b32.xlu0 %v737_v36, 256  ;;  %v587_v34 = vcombine.high %v2637_v28, %v2637_v28 }
 0x32b   :  { %879 = vbcast.lane.b32.xlu1 %v873_v29, 264  ;;  %886 = vbcast.lane.b32.xlu0 %v884_v37, 256  ;;  %v1369_v29 = vrot.slane %v3008_v63, %v2986_v24  ;;  %v512_v24 = vcombine.high %v504_v33, %v504_v33 }
 0x32d   :  { %v3046_v56 = vrot.slane %v512_v24, %v2974_v7 }
 0x32f   :  { %743 = vbcast.lane.b32.xlu1 %v737_v36, 264  ;;  %897 = vbcast.lane.b32.xlu0 %v895_v5, 256  ;;  %v627_v36 = vrot.slane %v619_v44, %v2881_v35  ;;  %v680_v44 = vrot.slane %v634_v38, %v2974_v7 }
 0x331   :  { %v635_v18 = vcombine.high %v627_v36, %v627_v36 }
 0x333   :  { %890 = vbcast.lane.b32.xlu1 %v884_v37, 264  ;;  %1022 = vbcast.lane.b32.xlu0 %v1020_v40, 256  ;;  %v511_v37 = vrot.slane %v497_v31, %v2881_v35  ;;  %v3061_v26 = vrot.slane %v635_v18, %v2974_v7  ;;  %v3070_v31 = vrot.slane %v785_v39, %v2974_v7 }
 0x334   :  { %v760_v39 = vrot.slane %v752_v14, %v2881_v35 }
 0x335   :  { %v513_v45 = vcombine.high %v511_v37, %v511_v37 }
 0x337   :  { %901 = vbcast.lane.b32.xlu1 %v895_v5, 264  ;;  %1033 = vbcast.lane.b32.xlu0 %v1031_v1, 256  ;;  %v2576_v5 = vpack.c.bf16 %v2200_v19, %v2199_v27  ;;  %v3064_v28 = vrot.slane %v513_v45, %v2974_v7  ;;  %v3091_v27 = vrot.slane %v2889_v43, %v2974_v7 }
 0x338   :  { %v1110_v45 = vcombine.high %v2896_v48, %v2896_v48 }
 0x339   :  { %2577 = vmatprep.subr.bf16.mxu1 %v2576_v5  ;;  %4517 = vst [vmem:[#allocation7_spill] sm:$0xff] %v3091_v27 }
 0x33a   :  { %2579 = vmatpush3.bf16.msra.mxu1 %v2576_v5  ;;  %v952_v5 = vcombine.high %v2893_v46, %v2893_v46 }
 0x33b   :  { %1026 = vbcast.lane.b32.xlu1 %v1020_v40, 264  ;;  %1044 = vbcast.lane.b32.xlu0 %v1042_v11, 256  ;;  %v792_v40 = vrot.slane %v778_v13, %v2881_v35  ;;  %v951_v13 = vcombine.high %v2886_v41, %v2886_v41  ;;  %v3102_v41 = vrot.slane %v2893_v46, %v2974_v7 }
 0x33c   :  { %v1109_v46 = vcombine.high %v2889_v43, %v2889_v43 }
 0x33d   :  { %v794_v58 = vcombine.high %v792_v40, %v792_v40  ;;  %v3076_v32 = vrot.slane %v792_v40, %v2974_v7  ;;  %v3119_v18 = vrot.slane %v951_v13, %v2974_v7  ;;  %v3160_v13 = vrot.slane %v2901_v50, %v2974_v7 }
 0x33f   :  { %1037 = vbcast.lane.b32.xlu1 %v1031_v1, 264  ;;  %1055 = vbcast.lane.b32.xlu0 %v1053_v42, 256  ;;  %v594_v1 = vrot.slane %v587_v34, %v2881_v35  ;;  %4522 = vst [vmem:[#allocation12_spill] sm:$0xff] %v3160_v13 }
 0x341   :  { %v602_v10 = vrot.slane %v594_v1, %v2881_v35 }
 0x343   :  { %1048 = vbcast.lane.b32.xlu1 %v1042_v11, 264  ;;  %1180 = vbcast.lane.b32.xlu0 %v1178_v47, 256  ;;  %v1494_v11 = vrot.slane %v3008_v63, %v2958_v52  ;;  %v2201_v52 = vld [vmem:[%s4395_s3 + $0x10] sm:$0xff]  ;;  %v640_v34 = vrot.slane %v602_v10, %v2974_v7  ;;  %v610_v2 = vcombine.high %v602_v10, %v602_v10 }
 0x347   :  { %1059 = vbcast.lane.b32.xlu1 %v1053_v42, 264  ;;  %1191 = vbcast.lane.b32.xlu0 %v1189_v51, 256  ;;  %v676_v42 = vrot.slane %v627_v36, %v2974_v7 }
 0x34b   :  { %1184 = vbcast.lane.b32.xlu1 %v1178_v47, 264  ;;  %1202 = vbcast.lane.b32.xlu0 %v1200_v53, 256  ;;  %v636_v47 = vcombine.high %v634_v38, %v634_v38  ;;  %v1516_v38 = vrot.slane %v3008_v63, %v2966_v57 }
 0x34f   :  { %1195 = vbcast.lane.b32.xlu1 %v1189_v51, 264  ;;  %1213 = vbcast.lane.b32.xlu0 %v1211_v0, 256  ;;  %v3040_v51 = vrot.slane %v504_v33, %v2974_v7  ;;  %v3083_v33 = vrot.slane %v794_v58, %v2974_v7 }
 0x353   :  { %1206 = vbcast.lane.b32.xlu1 %v1200_v53, 264  ;;  %1338 = vbcast.lane.b32.xlu0 %v1336_v4, 256  ;;  %v3043_v53 = vrot.slane %v511_v37, %v2974_v7  ;;  %v753_v37 = vcombine.high %v752_v14, %v752_v14  ;;  %v3138_v14 = vrot.slane %v952_v5, %v2974_v7 }
 0x355   :  { %v767_v58 = vrot.slane %v753_v37, %v2881_v35  ;;  %4519 = vst [vmem:[#allocation9_spill] sm:$0xff] %v3138_v14 }
 0x357   :  { %1217 = vbcast.lane.b32.xlu1 %v1211_v0, 264  ;;  %1349 = vbcast.lane.b32.xlu0 %v1347_v20, 256  ;;  %v2202_v0 = vld [vmem:[%s4395_s3 + $0x18] sm:$0xff]  ;;  %v769_v37 = vcombine.high %v767_v58, %v767_v58 }
 0x359   :  { %v3208_v8 = vrot.slane %v769_v37, %v2974_v7 }
 0x35b   :  { %1342 = vbcast.lane.b32.xlu1 %v1336_v4, 264  ;;  %1360 = vbcast.lane.b32.xlu0 %v1358_v30, 256  ;;  %v595_v4 = vcombine.high %v594_v1, %v594_v1 }
 0x35d   :  { %v609_v36 = vrot.slane %v595_v4, %v2881_v35  ;;  %v768_v4 = vcombine.high %v760_v39, %v760_v39 }
 0x35f   :  { %1353 = vbcast.lane.b32.xlu1 %v1347_v20, 264  ;;  %1371 = vbcast.lane.b32.xlu0 %v1369_v29, 256  ;;  %v2580_v20 = vpack.c.bf16 %v2202_v0, %v2201_v52  ;;  %v1527_v0 = vrot.slane %v3008_v63, %v2970_v62  ;;  %v611_v43 = vcombine.high %v609_v36, %v609_v36 }
 0x360   :  { %v3153_v62 = vrot.slane %v1109_v46, %v2974_v7  ;;  %v3156_v63 = vrot.slane %v1110_v45, %v2974_v7  ;;  %v3174_v45 = vrot.slane %v768_v4, %v2974_v7  ;;  %v3195_v4 = vrot.slane %v767_v58, %v2974_v7 }
 0x361   :  { %2581 = vmatprep.subr.bf16.mxu1 %v2580_v20  ;;  %v652_v46 = vrot.slane %v611_v43, %v2974_v7 }
 0x362   :  { %2583 = vmatpush3.bf16.msra.mxu1 %v2580_v20  ;;  %4520 = vst [vmem:[#allocation10_spill] sm:$0xff] %v3153_v62  ;;  %4521 = vst [vmem:[#allocation11_spill] sm:$0xff] %v3156_v63  ;;  %v3230_v63 = vrot.slane %v2917_v61, %v2974_v7 }
 0x363   :  { %1364 = vbcast.lane.b32.xlu1 %v1358_v30, 264  ;;  %1496 = vbcast.lane.b32.xlu0 %v1494_v11, 256  ;;  %v3067_v30 = vrot.slane %v636_v47, %v2974_v7  ;;  %v644_v47 = vrot.slane %v609_v36, %v2974_v7  ;;  %v3164_v36 = vrot.slane %v760_v39, %v2974_v7 }
 0x364   :  { %v927_v39 = vcombine.high %v2914_v60, %v2914_v60  ;;  %4525 = vst [vmem:[#allocation15_spill] sm:$0xff] %v3230_v63  ;;  %v1243_v63 = vcombine.high %v2927_v12, %v2927_v12 }
 0x366   :  { %v3226_v37 = vrot.slane %v927_v39, %v2974_v7 }
 0x367   :  { %1375 = vbcast.lane.b32.xlu1 %v1369_v29, 264  ;;  %1507 = vbcast.lane.b32.xlu0 %v1505_v23, 256 }
 0x368   :  { %4524 = vst [vmem:[#allocation14_spill] sm:$0xff] %v3226_v37 }
 0x369   :  { %v3093_v29 = vpop.permute.xlu0 %547  ;;  %v3095_v19 = vpop.permute.xlu1 %551 }
 0x36a   :  { %v3107_v24 = vmul.f32 %v640_v34, %v3093_v29  ;;  %v3110_v40 = vmul.f32 %v676_v42, %v3093_v29  ;;  %v3113_v1 = vmul.f32 %v640_v34, %v3095_v19  ;;  %v3116_v57 = vmul.f32 %v676_v42, %v3095_v19 }
 0x36b   :  { %1500 = vbcast.lane.b32.xlu1 %v1494_v11, 264  ;;  %1518 = vbcast.lane.b32.xlu0 %v1516_v38, 256  ;;  %v3129_v42 = vrot.slane %v2896_v48, %v2974_v7  ;;  %v648_v34 = vrot.slane %v610_v2, %v2974_v7 }
 0x36d   :  { %4518 = vst [vmem:[#allocation8_spill] sm:$0xff] %v3129_v42  ;;  %v3131_v11 = vpop.permute.xlu0 %558  ;;  %v3133_v52 = vpop.permute.xlu1 %562 }
 0x36e   :  { %v3141_v10 = vmul.f32 %v644_v47, %v3131_v11  ;;  %v3144_v35 = vmul.f32 %v680_v44, %v3131_v11  ;;  %v3147_v48 = vmul.f32 %v644_v47, %v3133_v52  ;;  %v3150_v20 = vmul.f32 %v680_v44, %v3133_v52 }
 0x36f   :  { %1511 = vbcast.lane.b32.xlu1 %v1505_v23, 264  ;;  %1529 = vbcast.lane.b32.xlu0 %v1527_v0, 256  ;;  %v1267_v23 = vcombine.high %v2901_v50, %v2901_v50  ;;  %v926_v47 = vcombine.high %v2907_v55, %v2907_v55  ;;  %v1268_v55 = vcombine.high %v2911_v59, %v2911_v59 }
 0x371   :  { %v3168_v44 = vpop.permute.xlu0 %569  ;;  %v3170_v5 = vpop.permute.xlu1 %573  ;;  %v3223_v13 = vrot.slane %v926_v47, %v2974_v7  ;;  %v3256_v27 = vrot.slane %v1267_v23, %v2974_v7 }
 0x372   :  { %v3181_v2 = vmul.f32 %v648_v34, %v3168_v44  ;;  %v3185_v50 = vmul.f32 %v3061_v26, %v3168_v44  ;;  %v3188_v15 = vmul.f32 %v648_v34, %v3170_v5  ;;  %v3192_v43 = vmul.f32 %v3061_v26, %v3170_v5 }
 0x373   :  { %1522 = vbcast.lane.b32.xlu1 %v1516_v38, 264  ;;  %v1084_v34 = vcombine.high %v2917_v61, %v2917_v61  ;;  %v1085_v26 = vcombine.high %v2921_v6, %v2921_v6  ;;  %v3214_v38 = vrot.slane %v2911_v59, %v2974_v7  ;;  %v3250_v61 = vrot.slane %v2921_v6, %v2974_v7 }
 0x374   :  { %4530 = vst [vmem:[#allocation20_spill] sm:$0xff] %v3256_v27  ;;  %v3269_v6 = vrot.slane %v2927_v12, %v2974_v7  ;;  %v1400_v12 = vcombine.high %v2932_v16, %v2932_v16 }
 0x375   :  { %4523 = vst [vmem:[#allocation13_spill] sm:$0xff] %v3214_v38  ;;  %v3218_v58 = vpop.permute.xlu0 %580  ;;  %v3220_v60 = vpop.permute.xlu1 %584  ;;  %v1242_v38 = vcombine.high %v2924_v9, %v2924_v9  ;;  %4528 = vst [vmem:[#allocation18_spill] sm:$0xff] %v3250_v61  ;;  %v3253_v42 = vrot.slane %v1084_v34, %v2974_v7 }
 0x376   :  { %v3235_v62 = vmul.f32 %v652_v46, %v3218_v58  ;;  %v3239_v59 = vmul.f32 %v3067_v30, %v3218_v58  ;;  %v3242_v47 = vmul.f32 %v652_v46, %v3220_v60  ;;  %v3246_v39 = vmul.f32 %v3067_v30, %v3220_v60  ;;  %4533 = vst [vmem:[#allocation23_spill] sm:$0xff] %v3269_v6 }
 0x377   :  { %1533 = vbcast.lane.b32.xlu1 %v1527_v0, 264  ;;  %4529 = vst [vmem:[#allocation19_spill] sm:$0xff] %v3253_v42  ;;  %v3261_v46 = vrot.slane %v1085_v26, %v2974_v7  ;;  %v3265_v30 = vrot.slane %v2924_v9, %v2974_v7  ;;  %v3272_v0 = vrot.slane %v1268_v55, %v2974_v7  ;;  %v4415_v6 = vsub.f32 1.0, %v3107_v24 }
 0x378   :  { %4526 = vst [vmem:[#allocation16_spill] sm:$0xff] %v3242_v47  ;;  %4527 = vst [vmem:[#allocation17_spill] sm:$0xff] %v3246_v39  ;;  %v3275_v27 = vrot.slane %v1242_v38, %v2974_v7  ;;  %v3279_v26 = vrot.slane %v2932_v16, %v2974_v7  ;;  %v3283_v9 = vrot.slane %v2935_v17, %v2974_v7 }
 0x379   :  { %4531 = vst [vmem:[#allocation21_spill] sm:$0xff] %v3261_v46  ;;  %4532 = vst [vmem:[#allocation22_spill] sm:$0xff] %v3265_v30  ;;  %v451_v34 = vpop.permute.xlu0 %450  ;;  %v455_v23 = vpop.permute.xlu1 %454  ;;  %v1425_v16 = vcombine.high %v2935_v17, %v2935_v17  ;;  %v3318_v30 = vrot.slane %v2941_v22, %v2974_v7 }
 0x37a   :  { %4534 = vst [vmem:[#allocation24_spill] sm:$0xff] %v3272_v0  ;;  %4535 = vst [vmem:[#allocation25_spill] sm:$0xff] %v3275_v27  ;;  %v3290_v0 = vmul.f32 %v3040_v51, %v451_v34  ;;  %v3293_v38 = vmul.f32 %v3040_v51, %v455_v23  ;;  %v4542_v51 = vsub.f32 1.0, %v3113_v1 }
 0x37b   :  { %4536 = vst [vmem:[#allocation26_spill] sm:$0xff] %v3279_v26  ;;  %4537 = vst [vmem:[#allocation27_spill] sm:$0xff] %v3283_v9  ;;  %v3296_v26 = vrot.slane %v1243_v63, %v2974_v7  ;;  %v3300_v9 = vrot.slane %v2938_v21, %v2974_v7 }
 0x37c   :  { %4538 = vst [vmem:[#allocation28_spill] sm:$0xff] %v3290_v0  ;;  %4539 = vst [vmem:[#allocation29_spill] sm:$0xff] %v3293_v38  ;;  %v1535_v55 = vmul.f32 %v4415_v6, %v3290_v0  ;;  %v1823_v34 = vmul.f32 %v3093_v29, %v3290_v0  ;;  %v1536_v23 = vmul.f32 %v4542_v51, %v3293_v38 }
 0x37d   :  { %4540 = vst [vmem:[#allocation30_spill] sm:$0xff] %v3296_v26  ;;  %4541 = vst [vmem:[#allocation31_spill] sm:$0xff] %v3300_v9  ;;  %v1824_v63 = vmul.f32 %v3095_v19, %v3293_v38  ;;  %v462_v27 = vpop.permute.xlu0 %461  ;;  %v466_v17 = vpop.permute.xlu1 %465  ;;  %v1401_v29 = vcombine.high %v2938_v21, %v2938_v21  ;;  %v4549_v21 = vsub.f32 1.0, %v3141_v10 }
 0x37e   :  { %4543 = vst [vmem:[#allocation32_spill] sm:$0xff] %v3318_v30  ;;  %v1832_v6 = vsel %vm1831_vm4, %v1823_v34, 0.0  ;;  %v3325_v46 = vmul.f32 %v3043_v53, %v462_v27  ;;  %v3328_v19 = vmul.f32 %v3043_v53, %v466_v17  ;;  %v3331_v26 = vadd.f32 %v1535_v55, %v3110_v40 }
 0x37f   :  { %v1833_v51 = vsel %vm1831_vm4, %v1824_v63, 0.0  ;;  %v3334_v42 = vadd.f32 %v1536_v23, %v3116_v57  ;;  %v3337_v30 = vrot.slane %v1400_v12, %v2974_v7  ;;  %v4550_v53 = vsub.f32 1.0, %v3147_v48 }
 0x380   :  { %4544 = vst [vmem:[#allocation33_spill] sm:$0xff] %v3325_v46  ;;  %4545 = vst [vmem:[#allocation34_spill] sm:$0xff] %v3328_v19  ;;  %v1834_v9 = vadd.f32 %v1833_v51, %v1832_v6  ;;  %v1537_v34 = vmul.f32 %v4549_v21, %v3325_v46  ;;  %v1825_v27 = vmul.f32 %v3131_v11, %v3325_v46 }
 0x381   :  { %4546 = vst [vmem:[#allocation35_spill] sm:$0xff] %v3331_v26  ;;  %4547 = vst [vmem:[#allocation36_spill] sm:$0xff] %v3334_v42  ;;  %v1538_v6 = vmul.f32 %v4550_v53, %v3328_v19  ;;  %v1826_v55 = vmul.f32 %v3133_v52, %v3328_v19  ;;  %v473_v17 = vpop.permute.xlu0 %472  ;;  %v477_v51 = vpop.permute.xlu1 %476  ;;  %v1426_v21 = vcombine.high %v2941_v22, %v2941_v22  ;;  %v4555_v22 = vsub.f32 1.0, %v3181_v2 }
 0x382   :  { %4548 = vst [vmem:[#allocation37_spill] sm:$0xff] %v3337_v30  ;;  %v1835_v12 = vrot.slane %v1834_v9, 4  ;;  %v1841_v30 = vsel %vm1831_vm4, %v1825_v27, 0.0  ;;  %v3356_v61 = vmul.f32 %v3046_v56, %v473_v17  ;;  %v3359_v53 = vmul.f32 %v3046_v56, %v477_v51 }
 0x383   :  { %v1842_v11 = vsel %vm1831_vm4, %v1826_v55, 0.0  ;;  %v3362_v63 = vadd.f32 %v1537_v34, %v3144_v35  ;;  %v3365_v14 = vadd.f32 %v1538_v6, %v3150_v20  ;;  %v4556_v17 = vsub.f32 1.0, %v3188_v15 }
 0x384   :  { %4551 = vst [vmem:[#allocation38_spill] sm:$0xff] %v3356_v61  ;;  %4552 = vst [vmem:[#allocation39_spill] sm:$0xff] %v3359_v53  ;;  %v1836_v52 = vadd.f32 %v1835_v12, %v1834_v9  ;;  %v1843_v23 = vadd.f32 %v1842_v11, %v1841_v30  ;;  %v1539_v27 = vmul.f32 %v4555_v22, %v3356_v61 }
 0x385   :  { %4553 = vst [vmem:[#allocation40_spill] sm:$0xff] %v3362_v63  ;;  %4554 = vst [vmem:[#allocation41_spill] sm:$0xff] %v3365_v14  ;;  %v1827_v55 = vmul.f32 %v3168_v44, %v3356_v61  ;;  %v1540_v56 = vmul.f32 %v4556_v17, %v3359_v53  ;;  %v1828_v30 = vmul.f32 %v3170_v5, %v3359_v53  ;;  %v484_v51 = vpop.permute.xlu0 %483  ;;  %v488_v11 = vpop.permute.xlu1 %487 }
 0x386   :  { %v1837_v6 = vrot.slane %v1836_v52, 2  ;;  %v1844_v12 = vrot.slane %v1843_v23, 4  ;;  %v3382_v44 = vmul.f32 %v3064_v28, %v484_v51  ;;  %v3385_v17 = vmul.f32 %v3064_v28, %v488_v11 }
 0x387   :  { %v1850_v22 = vsel %vm1831_vm4, %v1827_v55, 0.0  ;;  %v1851_v39 = vsel %vm1831_vm4, %v1828_v30, 0.0  ;;  %v3390_v9 = vadd.f32 %v1539_v27, %v3185_v50  ;;  %v3393_v34 = vadd.f32 %v1540_v56, %v3192_v43 }
 0x388   :  { %4557 = vst [vmem:[#allocation42_spill] sm:$0xff] %v3382_v44  ;;  %4558 = vst [vmem:[#allocation43_spill] sm:$0xff] %v3385_v17  ;;  %v3387_v37 = vadd.f32 %v1844_v12, %v1843_v23  ;;  %v1852_v5 = vadd.f32 %v1851_v39, %v1850_v22  ;;  %v4561_v55 = vsub.f32 1.0, %v3235_v62  ;;  %v1829_v30 = vmul.f32 %v3218_v58, %v3382_v44 }
 0x389   :  { %4559 = vst [vmem:[#allocation44_spill] sm:$0xff] %v3390_v9  ;;  %4560 = vst [vmem:[#allocation45_spill] sm:$0xff] %v3393_v34  ;;  %v1830_v28 = vmul.f32 %v3220_v60, %v3385_v17  ;;  %v3403_v23 = vrot.slane %v1425_v16, %v2974_v7  ;;  %v4563_v27 = vsub.f32 1.0, %v3242_v47  ;;  %v707_v56 = vpop.permute.xlu0 %706  ;;  %v711_v51 = vpop.permute.xlu1 %710  ;;  %v3411_v11 = vrot.slane %v1401_v29, %v2974_v7 }
 0x38a   :  { %v1541_v53 = vmul.f32 %v4561_v55, %v3382_v44  ;;  %v1853_v39 = vrot.slane %v1852_v5, 4  ;;  %v3414_v22 = vrot.slane %v1426_v21, %v2974_v7  ;;  %v1859_v60 = vsel %vm1831_vm4, %v1829_v30, 0.0 }
 0x38b   :  { %4562 = vst [vmem:[#allocation46_spill] sm:$0xff] %v3403_v23  ;;  %v3408_v12 = vmul.f32 %v4563_v27, %v3385_v17  ;;  %4565 = vst [vmem:[#allocation48_spill] sm:$0xff] %v3411_v11  ;;  %v1860_v16 = vsel %vm1831_vm4, %v1830_v28, 0.0  ;;  %v815_v55 = vmul.f32 %v3164_v36, %v707_v56  ;;  %v1868_v27 = vmul.f32 %v3331_v26, %v707_v56 }
 0x38c   :  { %4566 = vst [vmem:[#allocation49_spill] sm:$0xff] %v3414_v22  ;;  %v3420_v23 = vadd.f32 %v1860_v16, %v1859_v60  ;;  %v816_v17 = vmul.f32 %v3164_v36, %v711_v51  ;;  %v3424_v47 = vadd.f32 %v1837_v6, %v1836_v52  ;;  %v851_v7 = vmul.f32 %v3070_v31, %v707_v56 }
 0x38d   :  { %4564 = vst [vmem:[#allocation47_spill] sm:$0xff] %v3408_v12  ;;  %v823_v29 = vsub.f32 1.0, %v815_v55  ;;  %v1869_v21 = vmul.f32 %v3334_v42, %v711_v51  ;;  %v3429_v58 = vadd.f32 %v1541_v53, %v3239_v59  ;;  %v3431_v30 = vadd.f32 %v1853_v39, %v1852_v5  ;;  %v729_v36 = vpop.permute.xlu0 %728  ;;  %v718_v52 = vpop.permute.xlu1 %717 }
 0x38e   :  { %v1876_v28 = vsel %vm1831_vm4, %v1868_v27, 0.0  ;;  %v3434_v60 = vsub.f32 1.0, %v816_v17  ;;  %v3437_v16 = vmul.f32 %v3070_v31, %v711_v51  ;;  %v4568_v56 = vsub.f32 1.0, %v3107_v24 }
 0x38f   :  { %4567 = vst [vmem:[#allocation50_spill] sm:$0xff] %v3429_v58  ;;  %v1551_v6 = vmul.f32 %v823_v29, %v3110_v40  ;;  %v1877_v53 = vsel %vm1831_vm4, %v1869_v21, 0.0  ;;  %v819_v5 = vmul.f32 %v3174_v45, %v729_v36  ;;  %v4570_v31 = vsub.f32 1.0, %v3113_v1 }
 0x390   :  { %v3442_v55 = vmul.f32 %v823_v29, %v4568_v56  ;;  %v1552_v17 = vmul.f32 %v3434_v60, %v3116_v57  ;;  %v1878_v27 = vadd.f32 %v1877_v53, %v1876_v28  ;;  %v817_v56 = vmul.f32 %v3195_v4, %v718_v52 }
 0x391   :  { %v3452_v51 = vmul.f32 %v3434_v60, %v4570_v31  ;;  %v3454_v40 = vadd.f32 %v1551_v6, %v851_v7  ;;  %v3456_v24 = vsub.f32 1.0, %v819_v5  ;;  %v3464_v57 = vmul.f32 %v3073_v49, %v729_v36  ;;  %v865_v31 = vpop.permute.xlu0 %864 }
 0x392   :  { %4569 = vst [vmem:[#allocation51_spill] sm:$0xff] %v3442_v55  ;;  %v3461_v22 = vadd.f32 %v1552_v17, %v3437_v16  ;;  %v1879_v39 = vrot.slane %v1878_v27, 4  ;;  %v1872_v1 = vmul.f32 %v3390_v9, %v729_v36  ;;  %v4574_v6 = vsub.f32 1.0, %v3181_v2  ;;  %v722_v17 = vpop.permute.xlu1 %721 }
 0x393   :  { %4571 = vst [vmem:[#allocation52_spill] sm:$0xff] %v3452_v51  ;;  %4572 = vst [vmem:[#allocation53_spill] sm:$0xff] %v3454_v40  ;;  %v1555_v28 = vmul.f32 %v3456_v24, %v3185_v50  ;;  %v825_v5 = vsub.f32 1.0, %v817_v56  ;;  %v853_v21 = vmul.f32 %v3076_v32, %v718_v52  ;;  %v1870_v42 = vmul.f32 %v3362_v63, %v718_v52 }
 0x394   :  { %4573 = vst [vmem:[#allocation54_spill] sm:$0xff] %v3461_v22  ;;  %v3472_v53 = vmul.f32 %v3456_v24, %v4574_v6  ;;  %v1880_v11 = vadd.f32 %v1879_v39, %v1878_v27  ;;  %v1671_v26 = vmul.f32 %v3442_v55, %v3290_v0  ;;  %v973_v36 = vmul.f32 %v3199_v25, %v865_v31 }
 0x395   :  { %v3480_v9 = vadd.f32 %v1555_v28, %v3464_v57  ;;  %v1553_v2 = vmul.f32 %v825_v5, %v3144_v35  ;;  %v4577_v50 = vsub.f32 1.0, %v3141_v10  ;;  %v3488_v56 = vmul.f32 %v3080_v54, %v865_v31  ;;  %v876_v55 = vpop.permute.xlu0 %875 }
 0x396   :  { %4575 = vst [vmem:[#allocation55_spill] sm:$0xff] %v3472_v53  ;;  %v1881_v39 = vrot.slane %v1880_v11, 2  ;;  %v3491_v52 = vadd.f32 %v1671_v26, %v3454_v40  ;;  %v3493_v27 = vsub.f32 1.0, %v973_v36  ;;  %v818_v0 = vmul.f32 %v3195_v4, %v722_v17  ;;  %v733_v40 = vpop.permute.xlu1 %732 }
 0x397   :  { %4576 = vst [vmem:[#allocation56_spill] sm:$0xff] %v3480_v9  ;;  %v3485_v6 = vmul.f32 %v825_v5, %v4577_v50  ;;  %v1894_v28 = vsel %vm1831_vm4, %v1872_v1, 0.0  ;;  %v3497_v63 = vadd.f32 %v1553_v2, %v853_v21  ;;  %v1871_v10 = vmul.f32 %v3365_v14, %v722_v17 }
 0x398   :  { %4579 = vst [vmem:[#allocation58_spill] sm:$0xff] %v3491_v52  ;;  %v975_v35 = vmul.f32 %v3203_v3, %v876_v55  ;;  %v1882_v50 = vadd.f32 %v1881_v39, %v1880_v11  ;;  %v1885_v12 = vsel %vm1831_vm4, %v1870_v42, 0.0  ;;  %v1575_v44 = vmul.f32 %v3493_v27, %v851_v7 }
 0x399   :  { %4578 = vst [vmem:[#allocation57_spill] sm:$0xff] %v3485_v6  ;;  %4580 = vst [vmem:[#allocation59_spill] sm:$0xff] %v3497_v63  ;;  %v3504_v26 = vmul.f32 %v3493_v27, %v823_v29  ;;  %v1912_v36 = vmul.f32 %v3491_v52, %v865_v31  ;;  %v3507_v4 = vsub.f32 1.0, %v818_v0  ;;  %v1886_v1 = vsel %vm1831_vm4, %v1871_v10, 0.0  ;;  %v740_v10 = vpop.permute.xlu0 %739 }
 0x39a   :  { %v3510_v2 = vsub.f32 1.0, %v975_v35  ;;  %v3513_v14 = vadd.f32 %v1575_v44, %v3488_v56  ;;  %v3516_v11 = vmul.f32 %v3076_v32, %v722_v17  ;;  %v1887_v42 = vadd.f32 %v1886_v1, %v1885_v12 }
 0x39b   :  { %4581 = vst [vmem:[#allocation60_spill] sm:$0xff] %v3504_v26  ;;  %v3519_v7 = vmul.f32 %v3102_v41, %v876_v55  ;;  %v1554_v29 = vmul.f32 %v3507_v4, %v3150_v20  ;;  %v4583_v0 = vsub.f32 1.0, %v3147_v48  ;;  %v1883_v32 = vrot.slane %v1882_v50, 1 }
 0x39c   :  { %4582 = vst [vmem:[#allocation61_spill] sm:$0xff] %v3513_v14  ;;  %v1577_v39 = vmul.f32 %v3510_v2, %v853_v21  ;;  %v3530_v44 = vmul.f32 %v3510_v2, %v825_v5  ;;  %v1888_v17 = vrot.slane %v1887_v42, 4  ;;  %v1673_v12 = vmul.f32 %v3485_v6, %v3325_v46  ;;  %v869_v6 = vpop.permute.xlu1 %868 }
 0x39d   :  { %v3526_v31 = vmul.f32 %v3507_v4, %v4583_v0  ;;  %v820_v35 = vmul.f32 %v3174_v45, %v733_v40  ;;  %v1920_v20 = vsel %vm1831_vm4, %v1912_v36, 0.0  ;;  %v3537_v48 = vadd.f32 %v1554_v29, %v3516_v11 }
 0x39e   :  { %4585 = vst [vmem:[#allocation63_spill] sm:$0xff] %v3530_v44  ;;  %v3540_v1 = vadd.f32 %v1577_v39, %v3519_v7  ;;  %v1873_v21 = vmul.f32 %v3393_v34, %v733_v40  ;;  %v1889_v5 = vadd.f32 %v1888_v17, %v1887_v42  ;;  %v3544_v0 = vadd.f32 %v1673_v12, %v3497_v63 }
 0x39f   :  { %4584 = vst [vmem:[#allocation62_spill] sm:$0xff] %v3526_v31  ;;  %4586 = vst [vmem:[#allocation64_spill] sm:$0xff] %v3537_v48  ;;  %v3546_v52 = vsub.f32 1.0, %v820_v35  ;;  %v821_v46 = vmul.f32 %v3208_v8, %v740_v10  ;;  %v3550_v45 = vmul.f32 %v3073_v49, %v733_v40  ;;  %v1874_v29 = vmul.f32 %v3429_v58, %v740_v10 }
 0x3a0   :  { %4587 = vst [vmem:[#allocation65_spill] sm:$0xff] %v3540_v1  ;;  %4588 = vst [vmem:[#allocation66_spill] sm:$0xff] %v3544_v0  ;;  %v1895_v36 = vsel %vm1831_vm4, %v1873_v21, 0.0  ;;  %v1672_v39 = vmul.f32 %v3452_v51, %v3293_v38  ;;  %v1890_v34 = vrot.slane %v1889_v5, 2  ;;  %v1914_v42 = vmul.f32 %v3544_v0, %v876_v55 }
 0x3a1   :  { %v1556_v17 = vmul.f32 %v3546_v52, %v3192_v43  ;;  %v4589_v12 = vsub.f32 1.0, %v3188_v15  ;;  %v3564_v49 = vadd.f32 %v1883_v32, %v1882_v50  ;;  %v1896_v40 = vadd.f32 %v1895_v36, %v1894_v28 }
 0x3a2   :  { %v3566_v21 = vsub.f32 1.0, %v821_v46  ;;  %v3569_v63 = vadd.f32 %v1672_v39, %v3461_v22  ;;  %v1891_v38 = vadd.f32 %v1890_v34, %v1889_v5  ;;  %v3575_v55 = vmul.f32 %v3083_v33, %v740_v10 }
 0x3a3   :  { %v3562_v35 = vmul.f32 %v3546_v52, %v4589_v12  ;;  %4591 = vst [vmem:[#allocation68_spill] sm:$0xff] %v3564_v49  ;;  %v3572_v51 = vadd.f32 %v1556_v17, %v3550_v45  ;;  %v974_v15 = vmul.f32 %v3199_v25, %v869_v6  ;;  %v1897_v43 = vrot.slane %v1896_v40, 4 }
 0x3a4   :  { %4592 = vst [vmem:[#allocation69_spill] sm:$0xff] %v3569_v63  ;;  %v1557_v50 = vmul.f32 %v3566_v21, %v3239_v59  ;;  %v4594_v46 = vsub.f32 1.0, %v3235_v62  ;;  %v3586_v34 = vmul.f32 %v3080_v54, %v869_v6  ;;  %v3589_v32 = vsel %vm1831_vm4, %v1914_v42, 0.0  ;;  %v887_v42 = vpop.permute.xlu0 %886 }
 0x3a5   :  { %4590 = vst [vmem:[#allocation67_spill] sm:$0xff] %v3562_v35  ;;  %4593 = vst [vmem:[#allocation70_spill] sm:$0xff] %v3572_v51  ;;  %v3592_v10 = vsel %vm1831_vm4, %v1874_v29, 0.0  ;;  %v3594_v25 = vsub.f32 1.0, %v974_v15  ;;  %v1913_v5 = vmul.f32 %v3569_v63, %v869_v6  ;;  %v1898_v59 = vadd.f32 %v1897_v43, %v1896_v40 }
 0x3a6   :  { %v3583_v28 = vmul.f32 %v3566_v21, %v4594_v46  ;;  %v3598_v62 = vadd.f32 %v1557_v50, %v3575_v55  ;;  %v4597_v36 = vrot.slane %v3387_v37, 2  ;;  %v1855_v39 = vrot.slane %v3431_v30, 2 }
 0x3a7   :  { %v1892_v17 = vrot.slane %v1891_v38, 1  ;;  %v1576_v29 = vmul.f32 %v3594_v25, %v3437_v16  ;;  %v3608_v12 = vmul.f32 %v3594_v25, %v3434_v60  ;;  %v1921_v6 = vsel %vm1831_vm4, %v1913_v5, 0.0 }
 0x3a8   :  { %4595 = vst [vmem:[#allocation71_spill] sm:$0xff] %v3583_v28  ;;  %4596 = vst [vmem:[#allocation72_spill] sm:$0xff] %v3598_v62  ;;  %v1847_v54 = vadd.f32 %v4597_v36, %v3387_v37  ;;  %v1899_v40 = vrot.slane %v1898_v59, 2  ;;  %v1922_v15 = vadd.f32 %v1921_v6, %v1920_v20  ;;  %v1856_v50 = vadd.f32 %v1855_v39, %v3431_v30 }
 0x3a9   :  { %4598 = vst [vmem:[#allocation73_spill] sm:$0xff] %v3608_v12  ;;  %v3613_v37 = vadd.f32 %v1576_v29, %v3586_v34  ;;  %v4600_v46 = vrot.slane %v3420_v23, 4  ;;  %v1675_v60 = vmul.f32 %v3472_v53, %v3356_v61  ;;  %v977_v16 = vmul.f32 %v3223_v13, %v887_v42 }
 0x3aa   :  { %v1848_v43 = vrot.slane %v1847_v54, 1  ;;  %v1900_v5 = vadd.f32 %v1899_v40, %v1898_v59  ;;  %v1923_v63 = vrot.slane %v1922_v15, 4  ;;  %v1857_v6 = vrot.slane %v1856_v50, 1 }
 0x3ab   :  { %4599 = vst [vmem:[#allocation74_spill] sm:$0xff] %v3613_v37  ;;  %v1863_v36 = vadd.f32 %v4600_v46, %v3420_v23  ;;  %v4601_v30 = vrot.slane %v3424_v47, 1  ;;  %v3625_v0 = vadd.f32 %v1675_v60, %v3480_v9  ;;  %v3627_v49 = vsub.f32 1.0, %v977_v16  ;;  %v880_v23 = vpop.permute.xlu1 %879 }
 0x3ac   :  { %v1849_v20 = vadd.f32 %v1848_v43, %v1847_v54  ;;  %v1901_v46 = vrot.slane %v1900_v5, 1  ;;  %v1924_v22 = vadd.f32 %v1923_v63, %v1922_v15  ;;  %v1858_v61 = vadd.f32 %v1857_v6, %v1856_v50  ;;  %v898_v15 = vpop.permute.xlu0 %897 }
 0x3ad   :  { %v1840_v39 = vadd.f32 %v4601_v30, %v3424_v47  ;;  %v1864_v29 = vrot.slane %v1863_v36, 2  ;;  %4602 = vst [vmem:[#allocation75_spill] sm:$0xff] %v3625_v0  ;;  %v3630_v53 = vmul.f32 %v3119_v18, %v887_v42  ;;  %v1579_v54 = vmul.f32 %v3627_v49, %v3464_v57 }
 0x3ae   :  { %v3636_v47 = vmul.f32 %v3627_v49, %v3456_v24  ;;  %v1916_v40 = vmul.f32 %v3625_v0, %v887_v42  ;;  %v3639_v43 = vadd.f32 %v1892_v17, %v1891_v38  ;;  %v1925_v60 = vrot.slane %v1924_v22, 2  ;;  %v4608_v17 = vld [vmem:[#allocation42_spill] sm:$0xff] }
 0x3af   :  { %v1865_v59 = vadd.f32 %v1864_v29, %v1863_v36  ;;  %v2137_v16 = vsel %vm2136_vm5, %v1849_v20, %v1840_v39  ;;  %v1674_v63 = vmul.f32 %v3526_v31, %v3328_v19  ;;  %v3644_v50 = vadd.f32 %v1901_v46, %v1900_v5  ;;  %v4609_v29 = vld [vmem:[#allocation14_spill] sm:$0xff] }
 0x3b0   :  { %4603 = vst [vmem:[#allocation76_spill] sm:$0xff] %v3636_v47  ;;  %4604 = vst [vmem:[#allocation77_spill] sm:$0xff] %v3639_v43  ;;  %v3647_v57 = vadd.f32 %v1579_v54, %v3630_v53  ;;  %v976_v24 = vmul.f32 %v3203_v3, %v880_v23  ;;  %v1926_v6 = vadd.f32 %v1925_v60, %v1924_v22  ;;  %v3657_v39 = vsel %vm1831_vm4, %v1916_v40, 0.0  ;;  %v744_v54 = vpop.permute.xlu1 %743  ;;  %v4611_v60 = vld [vmem:[#allocation17_spill] sm:$0xff] }
 0x3b1   :  { %4605 = vst [vmem:[#allocation78_spill] sm:$0xff] %v3644_v50  ;;  %v1866_v36 = vrot.slane %v1865_v59, 1  ;;  %v2139_v42 = vsel %vm2138_vm6, %v1858_v61, %v2137_v16  ;;  %v3652_v38 = vadd.f32 %v1674_v63, %v3537_v48  ;;  %v1677_v20 = vmul.f32 %v3583_v28, %v4608_v17  ;;  %v4612_v16 = vld [vmem:[#allocation47_spill] sm:$0xff] }
 0x3b2   :  { %4606 = vst [vmem:[#allocation79_spill] sm:$0xff] %v3647_v57  ;;  %v3659_v5 = vsub.f32 1.0, %v976_v24  ;;  %v979_v46 = vmul.f32 %v4609_v29, %v898_v15  ;;  %v3663_v3 = vmul.f32 %v3102_v41, %v880_v23  ;;  %v3671_v63 = vadd.f32 %v4612_v16, %v4611_v60  ;;  %v1023_v16 = vpop.permute.xlu0 %1022 }
 0x3b3   :  { %4607 = vst [vmem:[#allocation80_spill] sm:$0xff] %v3652_v38  ;;  %v1867_v30 = vadd.f32 %v1866_v36, %v1865_v59  ;;  %v1915_v61 = vmul.f32 %v3652_v38, %v880_v23  ;;  %v3667_v22 = vadd.f32 %v1677_v20, %v3598_v62  ;;  %v1927_v24 = vrot.slane %v1926_v6, 1  ;;  %v4615_v38 = vld [vmem:[#allocation9_spill] sm:$0xff] }
 0x3b4   :  { %4613 = vst [vmem:[#allocation17_spill] sm:$0xff] %v3671_v63  ;;  %v1578_v40 = vmul.f32 %v3659_v5, %v3516_v11  ;;  %v3678_v36 = vmul.f32 %v3659_v5, %v3507_v4  ;;  %v3680_v41 = vsub.f32 1.0, %v979_v46  ;;  %v3685_v0 = vmul.f32 %v4615_v38, %v898_v15 }
 0x3b5   :  { %4610 = vst [vmem:[#allocation14_spill] sm:$0xff] %v3667_v22  ;;  %v2141_v59 = vsel %vm2140_vm7, %v1867_v30, %v2139_v42  ;;  %v1930_v20 = vsel %vm1831_vm4, %v1915_v61, 0.0  ;;  %v1918_v46 = vmul.f32 %v3667_v22, %v898_v15  ;;  %v822_v61 = vmul.f32 %v3208_v8, %v744_v54  ;;  %v4621_v22 = vld [vmem:[#allocation7_spill] sm:$0xff] }
 0x3b6   :  { %4614 = vst [vmem:[#allocation47_spill] sm:$0xff] %v3678_v36  ;;  %v2195_v23 = vsel %vm2194_vm8, 0.0, %v2141_v59  ;;  %v3689_v42 = vadd.f32 %v1578_v40, %v3663_v3  ;;  %v1931_v11 = vadd.f32 %v1930_v20, %v3589_v32  ;;  %v1581_v4 = vmul.f32 %v3680_v41, %v3575_v55  ;;  %v4619_v32 = vld [vmem:[#allocation35_spill] sm:$0xff] }
 0x3b7   :  { %2520 = vmatprep.mubr.msk.f32.mxu1 %vm1831_vm4, %v2195_v23  ;;  %v3696_v30 = vmul.f32 %v3680_v41, %v3566_v21  ;;  %v3701_v59 = vmul.f32 %v3083_v33, %v744_v54  ;;  %v1875_v23 = vmul.f32 %v3671_v63, %v744_v54  ;;  %v1687_v55 = vmul.f32 %v3504_v26, %v4619_v32  ;;  %v4620_v20 = vld [vmem:[#allocation15_spill] sm:$0xff]  ;;  %v891_v21 = vpop.permute.xlu1 %890  ;;  %v4623_v26 = vld [vmem:[#allocation16_spill] sm:$0xff] }
 0x3b8   :  { %4616 = vst [vmem:[#allocation9_spill] sm:$0xff] %v3689_v42  ;;  %v1932_v40 = vrot.slane %v1931_v11, 4  ;;  %v3705_v19 = vadd.f32 %v1581_v4, %v3685_v0  ;;  %v1131_v31 = vmul.f32 %v4620_v20, %v1023_v16  ;;  %v830_v48 = vsub.f32 1.0, %v822_v61  ;;  %v4622_v33 = vld [vmem:[#allocation39_spill] sm:$0xff] }
 0x3b9   :  { %4617 = vst [vmem:[#allocation81_spill] sm:$0xff] %v3696_v30  ;;  %v1904_v15 = vsel %vm1831_vm4, %v1875_v23, 0.0  ;;  %v3712_v8 = vmul.f32 %v4621_v22, %v1023_v16  ;;  %v1676_v17 = vmul.f32 %v3562_v35, %v4622_v33  ;;  %v1695_v4 = vadd.f32 %v1687_v55, %v3513_v14 }
 0x3ba   :  { %4618 = vst [vmem:[#allocation82_spill] sm:$0xff] %v3705_v19  ;;  %v1933_v54 = vadd.f32 %v1932_v40, %v1931_v11  ;;  %v1905_v28 = vadd.f32 %v1904_v15, %v3592_v10  ;;  %v3718_v62 = vsub.f32 1.0, %v1131_v31  ;;  %v1558_v32 = vmul.f32 %v830_v48, %v4611_v60  ;;  %v1034_v11 = vpop.permute.xlu0 %1033 }
 0x3bb   :  { %v4624_v50 = vsub.f32 1.0, %v4623_v26  ;;  %v3726_v23 = vadd.f32 %v1676_v17, %v3572_v51  ;;  %v978_v43 = vmul.f32 %v3223_v13, %v891_v21  ;;  %v3735_v60 = vadd.f32 %v1927_v24, %v1926_v6  ;;  %v4635_v51 = vld [vmem:[#allocation43_spill] sm:$0xff] }
 0x3bc   :  { %v1934_v9 = vrot.slane %v1933_v54, 2  ;;  %v1906_v33 = vrot.slane %v1905_v28, 4  ;;  %v1599_v10 = vmul.f32 %v3718_v62, %v3488_v56  ;;  %v3733_v31 = vmul.f32 %v3718_v62, %v3493_v27 }
 0x3bd   :  { %v3723_v61 = vmul.f32 %v830_v48, %v4624_v50  ;;  %4626 = vst [vmem:[#allocation7_spill] sm:$0xff] %v3726_v23  ;;  %v1947_v26 = vsel %vm1831_vm4, %v1918_v46, 0.0  ;;  %v3739_v50 = vadd.f32 %v1558_v32, %v3701_v59  ;;  %v3741_v17 = vsub.f32 1.0, %v978_v43  ;;  %v4631_v46 = vld [vmem:[#allocation18_spill] sm:$0xff]  ;;  %v902_v32 = vpop.permute.xlu1 %901 }
 0x3be   :  { %4627 = vst [vmem:[#allocation16_spill] sm:$0xff] %v3733_v31  ;;  %v1935_v13 = vadd.f32 %v1934_v9, %v1933_v54  ;;  %v1907_v40 = vadd.f32 %v1906_v33, %v1905_v28  ;;  %v3744_v55 = vadd.f32 %v1599_v10, %v3712_v8  ;;  %v1917_v56 = vmul.f32 %v3726_v23, %v891_v21  ;;  %v4634_v23 = vld [vmem:[#allocation8_spill] sm:$0xff] }
 0x3bf   :  { %4625 = vst [vmem:[#allocation15_spill] sm:$0xff] %v3723_v61  ;;  %4628 = vst [vmem:[#allocation83_spill] sm:$0xff] %v3739_v50  ;;  %v3748_v27 = vmul.f32 %v3119_v18, %v891_v21  ;;  %v1580_v6 = vmul.f32 %v3741_v17, %v3550_v45  ;;  %v3754_v24 = vmul.f32 %v3741_v17, %v3546_v52  ;;  %v4633_v45 = vld [vmem:[#allocation40_spill] sm:$0xff] }
 0x3c0   :  { %4629 = vst [vmem:[#allocation84_spill] sm:$0xff] %v3744_v55  ;;  %v1133_v43 = vmul.f32 %v4631_v46, %v1034_v11  ;;  %v1936_v9 = vrot.slane %v1935_v13, 1  ;;  %v1908_v28 = vrot.slane %v1907_v40, 2  ;;  %v1956_v15 = vmul.f32 %v1695_v4, %v1023_v16 }
 0x3c1   :  { %4630 = vst [vmem:[#allocation85_spill] sm:$0xff] %v3754_v24  ;;  %v1939_v33 = vsel %vm1831_vm4, %v1917_v56, 0.0  ;;  %v3759_v54 = vadd.f32 %v1580_v6, %v3748_v27  ;;  %v1689_v10 = vmul.f32 %v3530_v44, %v4633_v45  ;;  %v3767_v35 = vmul.f32 %v4634_v23, %v1034_v11  ;;  %v4638_v45 = vld [vmem:[#allocation44_spill] sm:$0xff] }
 0x3c2   :  { %v1940_v18 = vadd.f32 %v1939_v33, %v3657_v39  ;;  %v3762_v21 = vsub.f32 1.0, %v1133_v43  ;;  %v1909_v52 = vadd.f32 %v1908_v28, %v1907_v40  ;;  %v1678_v14 = vmul.f32 %v3723_v61, %v4635_v51  ;;  %v1045_v43 = vpop.permute.xlu0 %1044 }
 0x3c3   :  { %4632 = vst [vmem:[#allocation18_spill] sm:$0xff] %v3759_v54  ;;  %v980_v16 = vmul.f32 %v4609_v29, %v902_v32  ;;  %v1697_v6 = vadd.f32 %v1689_v10, %v3540_v1  ;;  %v1964_v28 = vsel %vm1831_vm4, %v1956_v15, 0.0  ;;  %v3791_v44 = vmul.f32 %v4615_v38, %v902_v32 }
 0x3c4   :  { %v1941_v4 = vrot.slane %v1940_v18, 4  ;;  %v1601_v56 = vmul.f32 %v3762_v21, %v3519_v7  ;;  %v3776_v39 = vmul.f32 %v3762_v21, %v3510_v2  ;;  %v1910_v40 = vrot.slane %v1909_v52, 1 }
 0x3c5   :  { %v3781_v33 = vadd.f32 %v1678_v14, %v3739_v50  ;;  %v3783_v51 = vsub.f32 1.0, %v980_v16  ;;  %v1958_v7 = vmul.f32 %v1697_v6, %v1034_v11  ;;  %v1691_v2 = vmul.f32 %v3636_v47, %v4638_v45  ;;  %v4640_v11 = vld [vmem:[#allocation19_spill] sm:$0xff]  ;;  %v1027_v6 = vpop.permute.xlu1 %1026  ;;  %v4642_v47 = vld [vmem:[#allocation36_spill] sm:$0xff] }
 0x3c6   :  { %4636 = vst [vmem:[#allocation8_spill] sm:$0xff] %v3776_v39  ;;  %v1942_v29 = vadd.f32 %v1941_v4, %v1940_v18  ;;  %v3786_v61 = vadd.f32 %v1601_v56, %v3767_v35  ;;  %v3799_v16 = vadd.f32 %v1936_v9, %v1935_v13  ;;  %v1135_v56 = vmul.f32 %v4640_v11, %v1045_v43 }
 0x3c7   :  { %4637 = vst [vmem:[#allocation86_spill] sm:$0xff] %v3781_v33  ;;  %v1582_v10 = vmul.f32 %v3783_v51, %v3701_v59  ;;  %v3796_v15 = vmul.f32 %v3783_v51, %v830_v48  ;;  %v1919_v14 = vmul.f32 %v3781_v33, %v902_v32  ;;  %v1699_v4 = vadd.f32 %v1691_v2, %v3647_v57  ;;  %v1056_v2 = vpop.permute.xlu0 %1055 }
 0x3c8   :  { %v1943_v18 = vrot.slane %v1942_v29, 2  ;;  %v3803_v45 = vadd.f32 %v1910_v40, %v1909_v52  ;;  %v1688_v48 = vmul.f32 %v3608_v12, %v4642_v47  ;;  %v1973_v13 = vsel %vm1831_vm4, %v1958_v7, 0.0  ;;  %v4652_v47 = vld [vmem:[#allocation41_spill] sm:$0xff] }
 0x3c9   :  { %4639 = vst [vmem:[#allocation87_spill] sm:$0xff] %v3796_v15  ;;  %v3806_v38 = vadd.f32 %v1582_v10, %v3791_v44  ;;  %v1948_v59 = vsel %vm1831_vm4, %v1919_v14, 0.0  ;;  %v3812_v9 = vsub.f32 1.0, %v1135_v56  ;;  %v1960_v33 = vmul.f32 %v1699_v4, %v1045_v43  ;;  %v4643_v14 = vld [vmem:[#allocation10_spill] sm:$0xff] }
 0x3ca   :  { %v1944_v50 = vadd.f32 %v1943_v18, %v1942_v29  ;;  %v1949_v32 = vadd.f32 %v1948_v59, %v1947_v26  ;;  %v1696_v57 = vadd.f32 %v1688_v48, %v3613_v37  ;;  %v1132_v52 = vmul.f32 %v4620_v20, %v1027_v6  ;;  %v4646_v48 = vld [vmem:[#allocation21_spill] sm:$0xff] }
 0x3cb   :  { %4641 = vst [vmem:[#allocation19_spill] sm:$0xff] %v3806_v38  ;;  %v1693_v40 = vmul.f32 %v3696_v30, %v3429_v58  ;;  %v3819_v1 = vmul.f32 %v4643_v14, %v1045_v43  ;;  %v1603_v29 = vmul.f32 %v3812_v9, %v3630_v53  ;;  %v3825_v26 = vmul.f32 %v3812_v9, %v3627_v49  ;;  %v1038_v53 = vpop.permute.xlu1 %1037 }
 0x3cc   :  { %v1950_v10 = vrot.slane %v1949_v32, 4  ;;  %v3827_v7 = vsub.f32 1.0, %v1132_v52  ;;  %v3830_v18 = vmul.f32 %v4621_v22, %v1027_v6  ;;  %v1957_v20 = vmul.f32 %v1696_v57, %v1027_v6 }
 0x3cd   :  { %4644 = vst [vmem:[#allocation10_spill] sm:$0xff] %v3825_v26  ;;  %v1701_v4 = vadd.f32 %v1693_v40, %v3705_v19  ;;  %v1945_v56 = vrot.slane %v1944_v50, 1  ;;  %v3834_v43 = vadd.f32 %v1603_v29, %v3819_v1  ;;  %v1137_v58 = vmul.f32 %v4646_v48, %v1056_v2  ;;  %v4649_v40 = vld [vmem:[#allocation11_spill] sm:$0xff]  ;;  %v1181_v29 = vpop.permute.xlu0 %1180 }
 0x3ce   :  { %v1951_v59 = vadd.f32 %v1950_v10, %v1949_v32  ;;  %v3838_v30 = vsel %vm1831_vm4, %v1960_v33, 0.0  ;;  %v1600_v49 = vmul.f32 %v3827_v7, %v3586_v34  ;;  %v3844_v22 = vmul.f32 %v3827_v7, %v3594_v25 }
 0x3cf   :  { %4645 = vst [vmem:[#allocation88_spill] sm:$0xff] %v3834_v43  ;;  %v1965_v57 = vsel %vm1831_vm4, %v1957_v20, 0.0  ;;  %v3847_v52 = vsub.f32 1.0, %v1137_v58  ;;  %v3850_v10 = vmul.f32 %v4649_v40, %v1056_v2  ;;  %v1962_v19 = vmul.f32 %v1701_v4, %v1056_v2  ;;  %v4656_v4 = vld [vmem:[#allocation53_spill] sm:$0xff] }
 0x3d0   :  { %4647 = vst [vmem:[#allocation21_spill] sm:$0xff] %v3844_v22  ;;  %v1952_v6 = vrot.slane %v1951_v59, 2  ;;  %v1966_v32 = vadd.f32 %v1965_v57, %v1964_v28  ;;  %v3853_v33 = vadd.f32 %v1600_v49, %v3830_v18  ;;  %v1690_v34 = vmul.f32 %v3678_v36, %v4652_v47 }
 0x3d1   :  { %4648 = vst [vmem:[#allocation89_spill] sm:$0xff] %v3847_v52  ;;  %4650 = vst [vmem:[#allocation11_spill] sm:$0xff] %v3850_v10  ;;  %v1134_v25 = vmul.f32 %v4631_v46, %v1038_v53  ;;  %v1605_v28 = vmul.f32 %v3847_v52, %v3685_v0  ;;  %v3862_v58 = vmul.f32 %v3847_v52, %v3680_v41  ;;  %v4658_v0 = vld [vmem:[#allocation51_spill] sm:$0xff]  ;;  %v1049_v52 = vpop.permute.xlu1 %1048 }
 0x3d2   :  { %4651 = vst [vmem:[#allocation90_spill] sm:$0xff] %v3853_v33  ;;  %v1953_v12 = vadd.f32 %v1952_v6, %v1951_v59  ;;  %v1967_v37 = vrot.slane %v1966_v32, 4  ;;  %v1698_v20 = vadd.f32 %v1690_v34, %v3689_v42  ;;  %v3868_v2 = vmul.f32 %v4634_v23, %v1038_v53 }
 0x3d3   :  { %4653 = vst [vmem:[#allocation91_spill] sm:$0xff] %v3862_v58  ;;  %v3865_v57 = vsub.f32 1.0, %v1134_v25  ;;  %v1703_v49 = vmul.f32 %v3733_v31, %v4656_v4  ;;  %v3873_v6 = vadd.f32 %v1605_v28, %v3850_v10  ;;  %v1719_v47 = vmul.f32 %v3733_v31, %v4658_v0  ;;  %v4661_v28 = vld [vmem:[#allocation22_spill] sm:$0xff]  ;;  %v1192_v10 = vpop.permute.xlu0 %1191 }
 0x3d4   :  { %4655 = vst [vmem:[#allocation93_spill] sm:$0xff] %v3868_v2  ;;  %v1954_v46 = vrot.slane %v1953_v12, 1  ;;  %v1968_v59 = vadd.f32 %v1967_v37, %v1966_v32  ;;  %v1959_v23 = vmul.f32 %v1698_v20, %v1038_v53  ;;  %v3884_v36 = vadd.f32 %v1945_v56, %v1944_v50  ;;  %v4660_v37 = vld [vmem:[#allocation28_spill] sm:$0xff]  ;;  %v4663_v53 = vld [vmem:[#allocation45_spill] sm:$0xff] }
 0x3d5   :  { %4654 = vst [vmem:[#allocation92_spill] sm:$0xff] %v3865_v57  ;;  %4657 = vst [vmem:[#allocation53_spill] sm:$0xff] %v3873_v6  ;;  %v1602_v41 = vmul.f32 %v3865_v57, %v3663_v3  ;;  %v3881_v34 = vmul.f32 %v3865_v57, %v3659_v5  ;;  %v1711_v25 = vadd.f32 %v1703_v49, %v3744_v55  ;;  %v3889_v0 = vsel %vm1831_vm4, %v1962_v19, 0.0  ;;  %v4664_v55 = vld [vmem:[#allocation23_spill] sm:$0xff] }
 0x3d6   :  { %v1969_v4 = vrot.slane %v1968_v59, 2  ;;  %v1775_v32 = vmul.f32 %v1719_v47, %v4660_v37  ;;  %v1289_v42 = vmul.f32 %v4661_v28, %v1181_v29  ;;  %v1974_v5 = vsel %vm1831_vm4, %v1959_v23, 0.0 }
 0x3d7   :  { %4659 = vst [vmem:[#allocation51_spill] sm:$0xff] %v3881_v34  ;;  %v3892_v3 = vadd.f32 %v1602_v41, %v3868_v2  ;;  %v1692_v20 = vmul.f32 %v3754_v24, %v4663_v53  ;;  %v1975_v56 = vadd.f32 %v1974_v5, %v1973_v13  ;;  %v3899_v47 = vadd.f32 %v1954_v46, %v1953_v12  ;;  %v4665_v2 = vld [vmem:[#allocation12_spill] sm:$0xff] }
 0x3d8   :  { %v1970_v50 = vadd.f32 %v1969_v4, %v1968_v59  ;;  %v1783_v49 = vadd.f32 %v1775_v32, %v1711_v25  ;;  %v3897_v31 = vsub.f32 1.0, %v1289_v42  ;;  %v1136_v19 = vmul.f32 %v4640_v11, %v1049_v52 }
 0x3d9   :  { %4662 = vst [vmem:[#allocation28_spill] sm:$0xff] %v3892_v3  ;;  %v1700_v37 = vadd.f32 %v1692_v20, %v3759_v54  ;;  %v1291_v57 = vmul.f32 %v4664_v55, %v1192_v10  ;;  %v1976_v41 = vrot.slane %v1975_v56, 4  ;;  %v3905_v3 = vmul.f32 %v4665_v2, %v1181_v29  ;;  %v4674_v54 = vld [vmem:[#allocation55_spill] sm:$0xff] }
 0x3da   :  { %v1623_v23 = vmul.f32 %v3897_v31, %v3712_v8  ;;  %v3911_v13 = vmul.f32 %v3897_v31, %v3718_v62  ;;  %v3913_v42 = vsub.f32 1.0, %v1136_v19  ;;  %v3916_v12 = vmul.f32 %v4643_v14, %v1049_v52  ;;  %v4667_v14 = vld [vmem:[#allocation13_spill] sm:$0xff] }
 0x3db   :  { %v1961_v46 = vmul.f32 %v1700_v37, %v1049_v52  ;;  %v3918_v11 = vsub.f32 1.0, %v1291_v57  ;;  %v1971_v59 = vrot.slane %v1970_v50, 1  ;;  %v1977_v25 = vadd.f32 %v1976_v41, %v1975_v56  ;;  %v1060_v52 = vpop.permute.xlu1 %1059  ;;  %v4670_v19 = vld [vmem:[#allocation57_spill] sm:$0xff] }
 0x3dc   :  { %v3921_v4 = vadd.f32 %v1623_v23, %v3905_v3  ;;  %v2000_v32 = vmul.f32 %v1783_v49, %v1181_v29  ;;  %v1604_v8 = vmul.f32 %v3913_v42, %v3748_v27  ;;  %v3927_v62 = vmul.f32 %v3913_v42, %v3741_v17  ;;  %v4669_v17 = vld [vmem:[#allocation59_spill] sm:$0xff] }
 0x3dd   :  { %v1983_v5 = vsel %vm1831_vm4, %v1961_v46, 0.0  ;;  %v3931_v20 = vmul.f32 %v4667_v14, %v1192_v10  ;;  %v1978_v57 = vrot.slane %v1977_v25, 2  ;;  %v1625_v37 = vmul.f32 %v3918_v11, %v3767_v35 }
 0x3de   :  { %4666 = vst [vmem:[#allocation22_spill] sm:$0xff] %v3927_v62  ;;  %v1984_v56 = vadd.f32 %v1983_v5, %v3838_v30  ;;  %v3938_v29 = vmul.f32 %v3918_v11, %v3762_v21  ;;  %v3941_v27 = vadd.f32 %v1604_v8, %v3916_v12  ;;  %v1705_v49 = vmul.f32 %v3776_v39, %v4669_v17  ;;  %v1203_v5 = vpop.permute.xlu0 %1202  ;;  %v4672_v17 = vld [vmem:[#allocation33_spill] sm:$0xff] }
 0x3df   :  { %v1721_v41 = vmul.f32 %v3776_v39, %v4670_v19  ;;  %v1694_v23 = vmul.f32 %v3796_v15, %v3671_v63  ;;  %v1979_v30 = vadd.f32 %v1978_v57, %v1977_v25  ;;  %v3950_v35 = vadd.f32 %v1625_v37, %v3931_v20  ;;  %v4673_v57 = vld [vmem:[#allocation56_spill] sm:$0xff] }
 0x3e0   :  { %4668 = vst [vmem:[#allocation23_spill] sm:$0xff] %v3941_v27  ;;  %v1985_v46 = vrot.slane %v1984_v56, 4  ;;  %v1138_v21 = vmul.f32 %v4646_v48, %v1060_v52  ;;  %v3953_v8 = vadd.f32 %v1971_v59, %v1970_v50  ;;  %v1713_v53 = vadd.f32 %v1705_v49, %v3786_v61  ;;  %v4675_v59 = vld [vmem:[#allocation25_spill] sm:$0xff] }
 0x3e1   :  { %v1777_v24 = vmul.f32 %v1721_v41, %v4672_v17  ;;  %v1702_v19 = vadd.f32 %v1694_v23, %v3806_v38  ;;  %v1980_v39 = vrot.slane %v1979_v30, 1  ;;  %v1707_v37 = vmul.f32 %v3825_v26, %v4673_v57 }
 0x3e2   :  { %4671 = vst [vmem:[#allocation12_spill] sm:$0xff] %v3953_v8  ;;  %v1986_v63 = vadd.f32 %v1985_v46, %v1984_v56  ;;  %v3958_v25 = vsub.f32 1.0, %v1138_v21  ;;  %v1723_v50 = vmul.f32 %v3825_v26, %v4674_v54  ;;  %v1293_v8 = vmul.f32 %v4675_v59, %v1203_v5  ;;  %v4677_v54 = vld [vmem:[#allocation38_spill] sm:$0xff] }
 0x3e3   :  { %v1785_v15 = vadd.f32 %v1777_v24, %v1713_v53  ;;  %v1963_v48 = vmul.f32 %v1702_v19, %v1060_v52  ;;  %v3966_v41 = vmul.f32 %v4649_v40, %v1060_v52  ;;  %v1715_v53 = vadd.f32 %v1707_v37, %v3834_v43 }
 0x3e4   :  { %v1987_v49 = vrot.slane %v1986_v63, 2  ;;  %v1606_v56 = vmul.f32 %v3958_v25, %v3791_v44  ;;  %v3972_v23 = vmul.f32 %v3958_v25, %v3783_v51  ;;  %v1779_v21 = vmul.f32 %v1723_v50, %v4677_v54  ;;  %v1185_v44 = vpop.permute.xlu1 %1184  ;;  %v4681_v50 = vld [vmem:[#allocation20_spill] sm:$0xff] }
 0x3e5   :  { %v2002_v46 = vmul.f32 %v1785_v15, %v1192_v10  ;;  %v1992_v24 = vsel %vm1831_vm4, %v1963_v48, 0.0  ;;  %v3983_v52 = vsub.f32 1.0, %v1293_v8  ;;  %v3985_v57 = vadd.f32 %v1980_v39, %v1979_v30  ;;  %v4680_v10 = vld [vmem:[#allocation54_spill] sm:$0xff]  ;;  %v4682_v30 = vld [vmem:[#allocation52_spill] sm:$0xff] }
 0x3e6   :  { %4676 = vst [vmem:[#allocation13_spill] sm:$0xff] %v3972_v23  ;;  %v3977_v17 = vadd.f32 %v1987_v49, %v1986_v63  ;;  %v3980_v19 = vadd.f32 %v1606_v56, %v3966_v41  ;;  %v1993_v40 = vadd.f32 %v1992_v24, %v3889_v0  ;;  %v2008_v51 = vsel %vm1831_vm4, %v2000_v32, 0.0 }
 0x3e7   :  { %4679 = vst [vmem:[#allocation57_spill] sm:$0xff] %v3985_v57  ;;  %v1787_v15 = vadd.f32 %v1779_v21, %v1715_v53  ;;  %v1704_v37 = vmul.f32 %v3844_v22, %v4680_v10  ;;  %v3991_v63 = vmul.f32 %v4681_v50, %v1203_v5  ;;  %v1627_v49 = vmul.f32 %v3983_v52, %v3819_v1  ;;  %v4683_v21 = vld [vmem:[#allocation29_spill] sm:$0xff] }
 0x3e8   :  { %4678 = vst [vmem:[#allocation59_spill] sm:$0xff] %v3977_v17  ;;  %v1994_v48 = vrot.slane %v1993_v40, 4  ;;  %v3997_v0 = vmul.f32 %v3983_v52, %v3812_v9  ;;  %v1720_v32 = vmul.f32 %v3844_v22, %v4682_v30  ;;  %v1290_v56 = vmul.f32 %v4661_v28, %v1185_v44  ;;  %v4696_v22 = vld [vmem:[#allocation11_spill] sm:$0xff] }
 0x3e9   :  { %v2004_v8 = vmul.f32 %v1787_v15, %v1203_v5  ;;  %v1712_v39 = vadd.f32 %v1704_v37, %v3853_v33  ;;  %v4005_v53 = vsel %vm1831_vm4, %v2002_v46, 0.0  ;;  %v4008_v1 = vadd.f32 %v1627_v49, %v3991_v63  ;;  %v4684_v15 = vld [vmem:[#allocation68_spill] sm:$0xff]  ;;  %v4685_v37 = vld [vmem:[#allocation77_spill] sm:$0xff]  ;;  %v4686_v46 = vld [vmem:[#allocation78_spill] sm:$0xff] }
 0x3ea   :  { %v1995_v54 = vadd.f32 %v1994_v48, %v1993_v40  ;;  %v1776_v9 = vmul.f32 %v1720_v32, %v4683_v21  ;;  %v4011_v10 = vsub.f32 1.0, %v1290_v56  ;;  %v4014_v5 = vmul.f32 %v4665_v2, %v1185_v44  ;;  %v4687_v49 = vld [vmem:[#allocation72_spill] sm:$0xff]  ;;  %v1214_v56 = vpop.permute.xlu0 %1213  ;;  %v4697_v33 = vld [vmem:[#allocation89_spill] sm:$0xff] }
 0x3eb   :  { %v2148_v28 = vsel %vm2147_vm9, %v4685_v37, %v4684_v15  ;;  %v4020_v30 = vsel %vm1831_vm4, %v2004_v8, 0.0  ;;  %v2158_v48 = vsel %vm2136_vm5, %v3799_v16, %v3735_v60  ;;  %v1709_v32 = vmul.f32 %v3862_v58, %v4687_v49  ;;  %v4689_v49 = vld [vmem:[#allocation30_spill] sm:$0xff] }
 0x3ec   :  { %v2150_v40 = vsel %vm2149_vm10, %v4686_v46, %v2148_v28  ;;  %v1784_v2 = vadd.f32 %v1776_v9, %v1712_v39  ;;  %v1624_v21 = vmul.f32 %v4011_v10, %v3830_v18  ;;  %v4033_v15 = vmul.f32 %v4011_v10, %v3827_v7  ;;  %v4688_v28 = vld [vmem:[#allocation71_spill] sm:$0xff]  ;;  %v1196_v9 = vpop.permute.xlu1 %1195 }
 0x3ed   :  { %v2159_v8 = vsel %vm2138_vm6, %v3884_v36, %v2158_v48  ;;  %v2152_v37 = vsel %vm2151_vm11, %v3803_v45, %v2150_v40  ;;  %v1717_v16 = vadd.f32 %v1709_v32, %v3873_v6  ;;  %v1725_v39 = vmul.f32 %v3862_v58, %v4688_v28  ;;  %v4690_v45 = vld [vmem:[#allocation42_spill] sm:$0xff] }
 0x3ee   :  { %v2160_v60 = vsel %vm2140_vm7, %v3899_v47, %v2159_v8  ;;  %v4045_v18 = vadd.f32 %v1624_v21, %v4014_v5  ;;  %v2001_v7 = vmul.f32 %v1784_v2, %v1185_v44  ;;  %v1295_v36 = vmul.f32 %v4689_v49, %v1214_v56  ;;  %v4691_v47 = vld [vmem:[#allocation64_spill] sm:$0xff]  ;;  %v4692_v8 = vld [vmem:[#allocation62_spill] sm:$0xff]  ;;  %v1339_v57 = vpop.permute.xlu0 %1338 }
 0x3ef   :  { %v2196_v46 = vsel %vm2194_vm8, %v2152_v37, %v2160_v60  ;;  %v1996_v48 = vrot.slane %v1995_v54, 2  ;;  %v1781_v40 = vmul.f32 %v1725_v39, %v4690_v45  ;;  %v1706_v32 = vmul.f32 %v3881_v34, %v4691_v47  ;;  %v4693_v44 = vld [vmem:[#allocation24_spill] sm:$0xff]  ;;  %v4695_v39 = vld [vmem:[#allocation34_spill] sm:$0xff] }
 0x3f0   :  { %2521 = vmatmul.mubr.msk.f32.vlgmr.msra.gmra.mrb[8].mxu1 %vm1831_vm4, %v2196_v46  ;;  %v1722_v28 = vmul.f32 %v3881_v34, %v4692_v8  ;;  %v2009_v24 = vsel %vm1831_vm4, %v2001_v7, 0.0  ;;  %v4056_v21 = vsub.f32 1.0, %v1295_v36  ;;  %v4059_v2 = vmul.f32 %v4693_v44, %v1214_v56  ;;  %v4694_v46 = vld [vmem:[#allocation28_spill] sm:$0xff]  ;;  %v4698_v36 = vld [vmem:[#allocation61_spill] sm:$0xff]  ;;  %v1207_v17 = vpop.permute.xlu1 %1206 }
 0x3f1   :  { %v1292_v37 = vmul.f32 %v4664_v55, %v1196_v9  ;;  %v2010_v60 = vadd.f32 %v2009_v24, %v2008_v51  ;;  %v1789_v58 = vadd.f32 %v1781_v40, %v1717_v16  ;;  %v1714_v6 = vadd.f32 %v1706_v32, %v4694_v46  ;;  %v4699_v16 = vld [vmem:[#allocation60_spill] sm:$0xff]  ;;  %v4700_v32 = vld [vmem:[#allocation93_spill] sm:$0xff] }
 0x3f2   :  { %v1778_v45 = vmul.f32 %v1722_v28, %v4695_v39  ;;  %v1629_v47 = vmul.f32 %v4056_v21, %v4696_v22  ;;  %v4068_v8 = vmul.f32 %v4056_v21, %v4697_v33  ;;  %v1727_v34 = vmul.f32 %v3911_v13, %v4698_v36  ;;  %v4701_v28 = vld [vmem:[#allocation92_spill] sm:$0xff] }
 0x3f3   :  { %v4070_v7 = vsub.f32 1.0, %v1292_v37  ;;  %v2011_v55 = vrot.slane %v2010_v60, 4  ;;  %v4075_v24 = vmul.f32 %v4667_v14, %v1196_v9  ;;  %v1743_v40 = vmul.f32 %v3911_v13, %v4699_v16  ;;  %v4702_v14 = vld [vmem:[#allocation35_spill] sm:$0xff] }
 0x3f4   :  { %v1786_v51 = vadd.f32 %v1778_v45, %v1714_v6  ;;  %v4080_v22 = vadd.f32 %v1629_v47, %v4059_v2  ;;  %v1735_v39 = vadd.f32 %v1727_v34, %v3921_v4  ;;  %v2006_v6 = vmul.f32 %v1789_v58, %v1214_v56  ;;  %v4703_v47 = vld [vmem:[#allocation26_spill] sm:$0xff]  ;;  %v4705_v4 = vld [vmem:[#allocation67_spill] sm:$0xff] }
 0x3f5   :  { %v1626_v33 = vmul.f32 %v4070_v7, %v4700_v32  ;;  %v4086_v37 = vmul.f32 %v4070_v7, %v4701_v28  ;;  %v2012_v36 = vadd.f32 %v2011_v55, %v2010_v60  ;;  %v1791_v46 = vmul.f32 %v1743_v40, %v4702_v14  ;;  %v4704_v32 = vld [vmem:[#allocation70_spill] sm:$0xff]  ;;  %v1350_v60 = vpop.permute.xlu0 %1349  ;;  %v4706_v40 = vld [vmem:[#allocation27_spill] sm:$0xff] }
 0x3f6   :  { %v2003_v45 = vmul.f32 %v1786_v51, %v1196_v9  ;;  %v4090_v26 = vadd.f32 %v1996_v48, %v1995_v54  ;;  %v1447_v16 = vmul.f32 %v4703_v47, %v1339_v57  ;;  %v1708_v43 = vmul.f32 %v3927_v62, %v4704_v32  ;;  %v4707_v14 = vld [vmem:[#allocation39_spill] sm:$0xff] }
 0x3f7   :  { %v4093_v13 = vadd.f32 %v1626_v33, %v4075_v24  ;;  %v2013_v28 = vrot.slane %v2012_v36, 2  ;;  %v1799_v34 = vadd.f32 %v1791_v46, %v1735_v39  ;;  %v1724_v58 = vmul.f32 %v3927_v62, %v4705_v4 }
 0x3f8   :  { %v2018_v38 = vsel %vm1831_vm4, %v2003_v45, 0.0  ;;  %v1455_v9 = vsub.f32 1.0, %v1447_v16  ;;  %v1716_v54 = vadd.f32 %v1708_v43, %v3941_v27  ;;  %v1294_v48 = vmul.f32 %v4675_v59, %v1207_v17 }
 0x3f9   :  { %v2019_v56 = vadd.f32 %v2018_v38, %v4005_v53  ;;  %v2014_v55 = vadd.f32 %v2013_v28, %v2012_v36  ;;  %v4105_v51 = vsel %vm1831_vm4, %v2006_v6, 0.0  ;;  %v1483_v33 = vmul.f32 %v4706_v40, %v1339_v57  ;;  %v4708_v36 = vld [vmem:[#allocation31_spill] sm:$0xff] }
 0x3fa   :  { %v1780_v45 = vmul.f32 %v1724_v58, %v4707_v14  ;;  %v1647_v39 = vmul.f32 %v1455_v9, %v3905_v3  ;;  %v4111_v32 = vmul.f32 %v1455_v9, %v3897_v31  ;;  %v4113_v38 = vsub.f32 1.0, %v1294_v48  ;;  %v4710_v48 = vld [vmem:[#allocation65_spill] sm:$0xff] }
 0x3fb   :  { %v2020_v46 = vrot.slane %v2019_v56, 4  ;;  %v2044_v43 = vmul.f32 %v1799_v34, %v1339_v57  ;;  %v4116_v59 = vmul.f32 %v4681_v50, %v1207_v17  ;;  %v1449_v6 = vmul.f32 %v4708_v36, %v1350_v60  ;;  %v4709_v57 = vld [vmem:[#allocation32_spill] sm:$0xff] }
 0x3fc   :  { %v1788_v53 = vadd.f32 %v1780_v45, %v1716_v54  ;;  %v4119_v28 = vadd.f32 %v1647_v39, %v1483_v33  ;;  %v1628_v4 = vmul.f32 %v4113_v38, %v3916_v12  ;;  %v4125_v3 = vmul.f32 %v4113_v38, %v3913_v42  ;;  %v4711_v33 = vld [vmem:[#allocation63_spill] sm:$0xff]  ;;  %v1218_v12 = vpop.permute.xlu1 %1217 }
 0x3fd   :  { %v2021_v16 = vadd.f32 %v2020_v46, %v2019_v56  ;;  %v2015_v31 = vrot.slane %v2014_v55, 1  ;;  %v1457_v9 = vsub.f32 1.0, %v1449_v6  ;;  %v1485_v34 = vmul.f32 %v4709_v57, %v1350_v60  ;;  %v4712_v46 = vld [vmem:[#allocation83_spill] sm:$0xff] }
 0x3fe   :  { %v2005_v58 = vmul.f32 %v1788_v53, %v1207_v17  ;;  %v4129_v50 = vadd.f32 %v1628_v4, %v4116_v59  ;;  %v1729_v56 = vmul.f32 %v3938_v29, %v4710_v48  ;;  %v1745_v14 = vmul.f32 %v3938_v29, %v4711_v33  ;;  %v4713_v48 = vld [vmem:[#allocation40_spill] sm:$0xff] }
 0x3ff   :  { %v2022_v54 = vrot.slane %v2021_v16, 2  ;;  %v1649_v42 = vmul.f32 %v1457_v9, %v3931_v20  ;;  %v4138_v17 = vmul.f32 %v1457_v9, %v3918_v11  ;;  %v1710_v39 = vmul.f32 %v3972_v23, %v4712_v46  ;;  %v1361_v9 = vpop.permute.xlu0 %1360 }
 0x400   :  { %v2027_v45 = vsel %vm1831_vm4, %v2005_v58, 0.0  ;;  %v1737_v4 = vadd.f32 %v1729_v56, %v3950_v35  ;;  %v1793_v62 = vmul.f32 %v1745_v14, %v4713_v48  ;;  %v4714_v58 = vld [vmem:[#allocation15_spill] sm:$0xff]  ;;  %v1296_v11 = vmul.f32 %v4689_v49, %v1218_v12 }
 0x401   :  { %v2023_v53 = vadd.f32 %v2022_v54, %v2021_v16  ;;  %v2028_v6 = vadd.f32 %v2027_v45, %v4020_v30  ;;  %v4145_v27 = vadd.f32 %v1649_v42, %v1485_v34  ;;  %v1718_v29 = vadd.f32 %v1710_v39, %v3980_v19  ;;  %v4715_v35 = vld [vmem:[#allocation43_spill] sm:$0xff]  ;;  %v4717_v42 = vld [vmem:[#allocation76_spill] sm:$0xff] }
 0x402   :  { %v1726_v20 = vmul.f32 %v3972_v23, %v4714_v58  ;;  %v4151_v33 = vadd.f32 %v2015_v31, %v2014_v55  ;;  %v4154_v16 = vsel %vm1831_vm4, %v2044_v43, 0.0  ;;  %v1801_v54 = vadd.f32 %v1793_v62, %v1737_v4  ;;  %v4716_v34 = vld [vmem:[#allocation79_spill] sm:$0xff]  ;;  %v4718_v31 = vld [vmem:[#allocation37_spill] sm:$0xff] }
 0x403   :  { %v2029_v30 = vrot.slane %v2028_v6, 4  ;;  %v4157_v14 = vsub.f32 1.0, %v1296_v11  ;;  %v1731_v45 = vmul.f32 %v3997_v0, %v4716_v34  ;;  %v1747_v46 = vmul.f32 %v3997_v0, %v4717_v42  ;;  %v4719_v0 = vld [vmem:[#allocation44_spill] sm:$0xff]  ;;  %v4721_v42 = vld [vmem:[#allocation74_spill] sm:$0xff] }
 0x404   :  { %v1782_v56 = vmul.f32 %v1726_v20, %v4715_v35  ;;  %v2024_v39 = vrot.slane %v2023_v53, 1  ;;  %v4164_v55 = vmul.f32 %v4693_v44, %v1218_v12  ;;  %v1451_v43 = vmul.f32 %v4718_v31, %v1361_v9 }
 0x405   :  { %v2030_v49 = vadd.f32 %v2029_v30, %v2028_v6  ;;  %v1630_v62 = vmul.f32 %v4157_v14, %v3966_v41  ;;  %v4171_v4 = vmul.f32 %v4157_v14, %v3958_v25  ;;  %v1739_v58 = vadd.f32 %v1731_v45, %v4008_v1  ;;  %v1343_v30 = vpop.permute.xlu1 %1342 }
 0x406   :  { %v1790_v48 = vadd.f32 %v1782_v56, %v1718_v29  ;;  %v2046_v11 = vmul.f32 %v1801_v54, %v1350_v60  ;;  %v1795_v35 = vmul.f32 %v1747_v46, %v4719_v0  ;;  %v1459_v6 = vsub.f32 1.0, %v1451_v43  ;;  %v4720_v29 = vld [vmem:[#allocation46_spill] sm:$0xff]  ;;  %v4722_v46 = vld [vmem:[#allocation73_spill] sm:$0xff] }
 0x407   :  { %v2031_v20 = vrot.slane %v2030_v49, 2  ;;  %v4176_v44 = vadd.f32 %v1630_v62, %v4164_v55  ;;  %v1487_v56 = vmul.f32 %v4720_v29, %v1361_v9  ;;  %v1728_v41 = vmul.f32 %v4033_v15, %v4721_v42 }
 0x408   :  { %v2007_v34 = vmul.f32 %v1790_v48, %v1218_v12  ;;  %v1803_v25 = vadd.f32 %v1795_v35, %v1739_v58  ;;  %v1651_v1 = vmul.f32 %v1459_v6, %v3991_v63  ;;  %v4185_v60 = vmul.f32 %v1459_v6, %v3983_v52  ;;  %v1372_v48 = vpop.permute.xlu0 %1371 }
 0x409   :  { %v4181_v23 = vadd.f32 %v2031_v20, %v2030_v49  ;;  %v1736_v45 = vadd.f32 %v1728_v41, %v4045_v18  ;;  %v1744_v12 = vmul.f32 %v4033_v15, %v4722_v46  ;;  %v1448_v43 = vmul.f32 %v4703_v47, %v1343_v30  ;;  %v4723_v20 = vld [vmem:[#allocation36_spill] sm:$0xff]  ;;  %v4724_v18 = vld [vmem:[#allocation82_spill] sm:$0xff] }
 0x40a   :  { %v2036_v54 = vsel %vm1831_vm4, %v2007_v34, 0.0  ;;  %v4192_v62 = vadd.f32 %v2024_v39, %v2023_v53  ;;  %v2061_v49 = vsel %vm1831_vm4, %v2046_v11, 0.0  ;;  %v4196_v63 = vadd.f32 %v1651_v1, %v1487_v56  ;;  %v4725_v34 = vld [vmem:[#allocation81_spill] sm:$0xff]  ;;  %v4726_v39 = vld [vmem:[#allocation48_spill] sm:$0xff]  ;;  %v4727_v46 = vld [vmem:[#allocation50_spill] sm:$0xff] }
 0x40b   :  { %v2037_v58 = vadd.f32 %v2036_v54, %v4105_v51  ;;  %v2033_v52 = vrot.slane %v4181_v23, 1  ;;  %v1792_v0 = vmul.f32 %v1744_v12, %v4723_v20  ;;  %v1456_v35 = vsub.f32 1.0, %v1448_v43  ;;  %v1354_v20 = vpop.permute.xlu1 %1353 }
 0x40c   :  { %v1733_v6 = vmul.f32 %v4068_v8, %v4724_v18  ;;  %v1484_v47 = vmul.f32 %v4706_v40, %v1343_v30  ;;  %v1749_v53 = vmul.f32 %v4068_v8, %v4725_v34  ;;  %v1453_v11 = vmul.f32 %v4726_v39, %v1372_v48  ;;  %v4728_v8 = vld [vmem:[#allocation9_spill] sm:$0xff] }
 0x40d   :  { %v2038_v15 = vrot.slane %v2037_v58, 4  ;;  %v1800_v42 = vadd.f32 %v1792_v0, %v1736_v45  ;;  %v1648_v51 = vmul.f32 %v1456_v35, %v4014_v5  ;;  %v4208_v56 = vmul.f32 %v1456_v35, %v4011_v10  ;;  %v4729_v45 = vld [vmem:[#allocation47_spill] sm:$0xff]  ;;  %v4730_v10 = vld [vmem:[#allocation49_spill] sm:$0xff] }
 0x40e   :  { %v1741_v41 = vadd.f32 %v1733_v6, %v4080_v22  ;;  %v2048_v54 = vmul.f32 %v1803_v25, %v1361_v9  ;;  %v1797_v12 = vmul.f32 %v1749_v53, %v4727_v46  ;;  %v1461_v43 = vsub.f32 1.0, %v1453_v11  ;;  %v4731_v6 = vld [vmem:[#allocation41_spill] sm:$0xff] }
 0x40f   :  { %v2039_v1 = vadd.f32 %v2038_v15, %v2037_v58  ;;  %v4212_v40 = vadd.f32 %v1648_v51, %v1484_v47  ;;  %v2045_v18 = vmul.f32 %v1800_v42, %v1343_v30  ;;  %v1730_v34 = vmul.f32 %v4086_v37, %v4728_v8 }
 0x410   :  { %v1746_v5 = vmul.f32 %v4086_v37, %v4729_v45  ;;  %v1805_v0 = vadd.f32 %v1797_v12, %v1741_v41  ;;  %v1489_v35 = vmul.f32 %v4730_v10, %v1372_v48  ;;  %v1653_v22 = vmul.f32 %v1461_v43, %v4059_v2  ;;  %v4733_v12 = vld [vmem:[#allocation16_spill] sm:$0xff] }
 0x411   :  { %v4221_v9 = vmul.f32 %v1461_v43, %v4056_v21  ;;  %v2053_v25 = vsel %vm1831_vm4, %v2045_v18, 0.0  ;;  %v1738_v58 = vadd.f32 %v1730_v34, %v4093_v13  ;;  %v1450_v15 = vmul.f32 %v4708_v36, %v1354_v20  ;;  %v4732_v21 = vld [vmem:[#allocation84_spill] sm:$0xff]  ;;  %v4734_v36 = vld [vmem:[#allocation18_spill] sm:$0xff] }
 0x412   :  { %v1794_v30 = vmul.f32 %v1746_v5, %v4731_v6  ;;  %v2040_v47 = vrot.slane %v2039_v1, 2  ;;  %v2070_v53 = vsel %vm1831_vm4, %v2048_v54, 0.0  ;;  %v2054_v37 = vadd.f32 %v2053_v25, %v4154_v16  ;;  %v1365_v54 = vpop.permute.xlu1 %1364  ;;  %v4735_v5 = vld [vmem:[#allocation58_spill] sm:$0xff] }
 0x413   :  { %v4229_v11 = vadd.f32 %v1653_v22, %v1489_v35  ;;  %v2050_v42 = vmul.f32 %v1805_v0, %v1372_v48  ;;  %v1458_v51 = vsub.f32 1.0, %v1450_v15  ;;  %v1751_v41 = vmul.f32 %v4111_v32, %v4732_v21  ;;  %v4736_v35 = vld [vmem:[#allocation85_spill] sm:$0xff] }
 0x414   :  { %v1802_v2 = vadd.f32 %v1794_v30, %v1738_v58  ;;  %v2055_v46 = vrot.slane %v2054_v37, 4  ;;  %v1486_v13 = vmul.f32 %v4709_v57, %v1354_v20  ;;  %v1767_v43 = vmul.f32 %v4111_v32, %v4733_v12  ;;  %v1497_v58 = vpop.permute.xlu0 %1496  ;;  %v4737_v30 = vld [vmem:[#allocation45_spill] sm:$0xff] }
 0x415   :  { %v1732_v18 = vmul.f32 %v4125_v3, %v4734_v36  ;;  %v1650_v16 = vmul.f32 %v1458_v51, %v4075_v24  ;;  %v4240_v8 = vmul.f32 %v1458_v51, %v4070_v7  ;;  %v1759_v34 = vadd.f32 %v1751_v41, %v4119_v28  ;;  %v4739_v51 = vld [vmem:[#allocation19_spill] sm:$0xff]  ;;  %v4740_v36 = vld [vmem:[#allocation66_spill] sm:$0xff] }
 0x416   :  { %v2047_v48 = vmul.f32 %v1802_v2, %v1354_v20  ;;  %v2056_v45 = vadd.f32 %v2055_v46, %v2054_v37  ;;  %v1807_v0 = vmul.f32 %v1767_v43, %v4735_v5  ;;  %v1748_v32 = vmul.f32 %v4125_v3, %v4736_v35  ;;  %v4738_v2 = vld [vmem:[#allocation8_spill] sm:$0xff] }
 0x417   :  { %v1740_v57 = vadd.f32 %v1732_v18, %v4129_v50  ;;  %v4247_v22 = vadd.f32 %v1650_v16, %v1486_v13  ;;  %v1452_v24 = vmul.f32 %v4718_v31, %v1365_v54  ;;  %v1488_v7 = vmul.f32 %v4720_v29, %v1365_v54  ;;  %v1376_v29 = vpop.permute.xlu1 %1375 }
 0x418   :  { %v2062_v25 = vsel %vm1831_vm4, %v2047_v48, 0.0  ;;  %v2057_v20 = vrot.slane %v2056_v45, 2  ;;  %v1815_v28 = vadd.f32 %v1807_v0, %v1759_v34  ;;  %v1796_v15 = vmul.f32 %v1748_v32, %v4737_v30  ;;  %v4741_v0 = vld [vmem:[#allocation87_spill] sm:$0xff] }
 0x419   :  { %v2063_v6 = vadd.f32 %v2062_v25, %v2061_v49  ;;  %v1460_v37 = vsub.f32 1.0, %v1452_v24  ;;  %v1753_v50 = vmul.f32 %v4138_v17, %v3786_v61  ;;  %v1769_v3 = vmul.f32 %v4138_v17, %v4738_v2 }
 0x41a   :  { %v1734_v21 = vmul.f32 %v4171_v4, %v4739_v51  ;;  %v2058_v41 = vadd.f32 %v2057_v20, %v2056_v45  ;;  %v2088_v31 = vmul.f32 %v1815_v28, %v1497_v58  ;;  %v1804_v13 = vadd.f32 %v1796_v15, %v1740_v57  ;;  %v4745_v15 = vld [vmem:[#allocation59_spill] sm:$0xff] }
 0x41b   :  { %v2064_v46 = vrot.slane %v2063_v6, 4  ;;  %v1652_v49 = vmul.f32 %v1460_v37, %v4116_v59  ;;  %v4261_v12 = vmul.f32 %v1460_v37, %v4113_v38  ;;  %v1761_v43 = vadd.f32 %v1753_v50, %v4145_v27 }
 0x41c   :  { %v1809_v61 = vmul.f32 %v1769_v3, %v4740_v36  ;;  %v2041_v18 = vadd.f32 %v2040_v47, %v2039_v1  ;;  %v2059_v16 = vrot.slane %v2058_v41, 1  ;;  %v2049_v48 = vmul.f32 %v1804_v13, %v1365_v54  ;;  %v4742_v54 = vld [vmem:[#allocation17_spill] sm:$0xff] }
 0x41d   :  { %v2065_v17 = vadd.f32 %v2064_v46, %v2063_v6  ;;  %v4265_v34 = vadd.f32 %v1652_v49, %v1488_v7  ;;  %v1742_v5 = vadd.f32 %v1734_v21, %v4176_v44  ;;  %v1750_v57 = vmul.f32 %v4171_v4, %v4741_v0  ;;  %v1508_v44 = vpop.permute.xlu0 %1507  ;;  %v4743_v7 = vld [vmem:[#allocation88_spill] sm:$0xff]  ;;  %v1501_v6 = vpop.permute.xlu1 %1500  ;;  %v4747_v46 = vld [vmem:[#allocation75_spill] sm:$0xff] }
 0x41e   :  { %v1817_v45 = vadd.f32 %v1809_v61, %v1761_v43  ;;  %v2079_v59 = vsel %vm1831_vm4, %v2050_v42, 0.0  ;;  %v2071_v35 = vsel %vm1831_vm4, %v2049_v48, 0.0  ;;  %v1454_v27 = vmul.f32 %v4726_v39, %v1376_v29  ;;  %v4744_v42 = vld [vmem:[#allocation10_spill] sm:$0xff]  ;;  %v4749_v48 = vld [vmem:[#allocation57_spill] sm:$0xff] }
 0x41f   :  { %v2066_v38 = vrot.slane %v2065_v17, 2  ;;  %v4273_v32 = vadd.f32 %v2059_v16, %v2058_v41  ;;  %v4276_v1 = vsel %vm1831_vm4, %v2088_v31, 0.0  ;;  %v2072_v47 = vadd.f32 %v2071_v35, %v2070_v53 }
 0x420   :  { %v1798_v25 = vmul.f32 %v1750_v57, %v4742_v54  ;;  %v1462_v24 = vsub.f32 1.0, %v1454_v27  ;;  %v1755_v4 = vmul.f32 %v4185_v60, %v4743_v7  ;;  %v1771_v20 = vmul.f32 %v4185_v60, %v4744_v42 }
 0x421   :  { %v2067_v58 = vadd.f32 %v2066_v38, %v2065_v17  ;;  %v2073_v28 = vrot.slane %v2072_v47, 4  ;;  %v1490_v30 = vmul.f32 %v4730_v10, %v1376_v29  ;;  %v4746_v37 = vrot.slane %v4745_v15, 1  ;;  %v1519_v16 = vpop.permute.xlu0 %1518  ;;  %v4748_v17 = vld [vmem:[#allocation12_spill] sm:$0xff]  ;;  %v1512_v0 = vpop.permute.xlu1 %1511 }
 0x422   :  { %v1806_v39 = vadd.f32 %v1798_v25, %v1742_v5  ;;  %v1654_v2 = vmul.f32 %v1462_v24, %v4164_v55  ;;  %v1670_v3 = vmul.f32 %v1462_v24, %v4157_v14  ;;  %v1763_v51 = vadd.f32 %v1755_v4, %v4196_v63  ;;  %v4752_v24 = vld [vmem:[#allocation53_spill] sm:$0xff]  ;;  %v4753_v4 = vld [vmem:[#allocation91_spill] sm:$0xff] }
 0x423   :  { %v1990_v53 = vadd.f32 %v4746_v37, %v4745_v15  ;;  %v2068_v50 = vrot.slane %v2067_v58, 1  ;;  %v2074_v21 = vadd.f32 %v2073_v28, %v2072_v47  ;;  %v1811_v60 = vmul.f32 %v1771_v20, %v4747_v46  ;;  %v4754_v20 = vld [vmem:[#allocation69_spill] sm:$0xff]  ;;  %v4756_v15 = vld [vmem:[#allocation51_spill] sm:$0xff] }
 0x424   :  { %v2051_v41 = vmul.f32 %v1806_v39, %v1376_v29  ;;  %v1998_v31 = vrot.slane %v4090_v26, 1  ;;  %v2090_v13 = vmul.f32 %v1817_v45, %v1508_v44  ;;  %v1662_v49 = vadd.f32 %v1654_v2, %v1490_v30  ;;  %v4755_v39 = vld [vmem:[#allocation28_spill] sm:$0xff]  ;;  %v4758_v2 = vld [vmem:[#allocation14_spill] sm:$0xff] }
 0x425   :  { %v2034_v10 = vadd.f32 %v2033_v52, %v4181_v23  ;;  %v2042_v43 = vrot.slane %v2041_v18, 1  ;;  %v2075_v36 = vrot.slane %v2074_v21, 2  ;;  %v1819_v61 = vadd.f32 %v1811_v60, %v1763_v51 }
 0x426   :  { %v2080_v55 = vsel %vm1831_vm4, %v2051_v41, 0.0  ;;  %v1999_v14 = vadd.f32 %v1998_v31, %v4090_v26  ;;  %v2166_v5 = vsel %vm2147_vm9, %v4749_v48, %v4748_v17  ;;  %v2174_v45 = vsel %vm2136_vm5, %v4192_v62, %v4151_v33  ;;  %v4751_v33 = vld [vmem:[#allocation21_spill] sm:$0xff]  ;;  %v4760_v31 = vld [vmem:[#allocation80_spill] sm:$0xff]  ;;  %v1530_v48 = vpop.permute.xlu0 %1529 }
 0x427   :  { %v2081_v63 = vadd.f32 %v2080_v55, %v2079_v59  ;;  %v2043_v29 = vadd.f32 %v2042_v43, %v2041_v18  ;;  %v2069_v23 = vadd.f32 %v2068_v50, %v2067_v58  ;;  %v2076_v52 = vadd.f32 %v2075_v36, %v2074_v21  ;;  %v4750_v59 = vld [vmem:[#allocation90_spill] sm:$0xff]  ;;  %v4761_v55 = vld [vmem:[#allocation7_spill] sm:$0xff] }
 0x428   :  { %v2167_v57 = vsel %vm2149_vm10, %v1990_v53, %v2166_v5  ;;  %v2175_v38 = vsel %vm2138_vm6, %v2034_v10, %v2174_v45  ;;  %v1752_v27 = vmul.f32 %v4208_v56, %v4750_v59  ;;  %v2092_v54 = vmul.f32 %v1819_v61, %v1519_v16  ;;  %v4759_v21 = vld [vmem:[#allocation22_spill] sm:$0xff]  ;;  %v4762_v16 = vld [vmem:[#allocation13_spill] sm:$0xff] }
 0x429   :  { %v2082_v35 = vrot.slane %v2081_v63, 4  ;;  %v2168_v26 = vsel %vm2151_vm11, %v1999_v14, %v2167_v57  ;;  %v2176_v18 = vsel %vm2140_vm7, %v2043_v29, %v2175_v38  ;;  %v2077_v47 = vrot.slane %v2076_v52, 1  ;;  %v4763_v38 = vld [vmem:[#allocation86_spill] sm:$0xff] }
 0x42a   :  { %v2197_v25 = vsel %vm2194_vm8, %v2168_v26, %v2176_v18  ;;  %v1768_v62 = vmul.f32 %v4208_v56, %v4751_v33  ;;  %v1760_v44 = vadd.f32 %v1752_v27, %v4212_v40  ;;  %v1757_v7 = vmul.f32 %v4221_v9, %v4752_v24  ;;  %v4757_v56 = vld [vmem:[#allocation23_spill] sm:$0xff] }
 0x42b   :  { %v2083_v58 = vadd.f32 %v2082_v35, %v2081_v63  ;;  %2523 = vmatprep.mubr.msk.f32.mxu1 %vm1831_vm4, %v2197_v25  ;;  %v1773_v42 = vmul.f32 %v4221_v9, %v4753_v4  ;;  %v1754_v30 = vmul.f32 %v4240_v8, %v4755_v39  ;;  %v1770_v37 = vmul.f32 %v4240_v8, %v4756_v15  ;;  %v1523_v9 = vpop.permute.xlu1 %1522 }
 0x42c   :  { %v1808_v28 = vmul.f32 %v1768_v62, %v4754_v20  ;;  %v1756_v53 = vmul.f32 %v4261_v12, %v4757_v56  ;;  %v1765_v40 = vadd.f32 %v1757_v7, %v4229_v11  ;;  %v1772_v41 = vmul.f32 %v4261_v12, %v4759_v21 }
 0x42d   :  { %v2084_v50 = vrot.slane %v2083_v58, 2  ;;  %v1813_v51 = vmul.f32 %v1773_v42, %v4758_v2  ;;  %v1762_v60 = vadd.f32 %v1754_v30, %v4247_v22  ;;  %v1810_v10 = vmul.f32 %v1770_v37, %v4760_v31 }
 0x42e   :  { %v1816_v46 = vadd.f32 %v1808_v28, %v1760_v44  ;;  %v1764_v43 = vadd.f32 %v1756_v53, %v4265_v34  ;;  %v1812_v61 = vmul.f32 %v1772_v41, %v4761_v55  ;;  %v1758_v14 = vmul.f32 %v1670_v3, %v3980_v19  ;;  %v2309_v55 = vld [vmem:[%s4396_s4 + $0x8] sm:$0xff] }
 0x42f   :  { %v2085_v8 = vadd.f32 %v2084_v50, %v2083_v58  ;;  %v1821_v36 = vadd.f32 %v1813_v51, %v1765_v40  ;;  %v1818_v63 = vadd.f32 %v1810_v10, %v1762_v60  ;;  %v1774_v29 = vmul.f32 %v1670_v3, %v4762_v16 }
 0x430   :  { %v2089_v11 = vmul.f32 %v1816_v46, %v1501_v6  ;;  %v2078_v17 = vadd.f32 %v2077_v47, %v2076_v52  ;;  %v2105_v12 = vsel %vm1831_vm4, %v2090_v13, 0.0  ;;  %v1820_v5 = vadd.f32 %v1812_v61, %v1764_v43  ;;  %v1534_v52 = vpop.permute.xlu1 %1533  ;;  %v2310_v61 = vld [vmem:[%s4396_s4 + $0x10] sm:$0xff] }
 0x431   :  { %v1766_v22 = vadd.f32 %v1758_v14, %v1662_v49  ;;  %v2086_v45 = vrot.slane %v2085_v8, 1  ;;  %v2091_v34 = vmul.f32 %v1818_v63, %v1512_v0  ;;  %v1814_v35 = vmul.f32 %v1774_v29, %v4763_v38  ;;  %v4764_v29 = vld [vmem:[#allocation4_spill] sm:$0xff] }
 0x432   :  { %v2097_v57 = vsel %vm1831_vm4, %v2089_v11, 0.0  ;;  %v2182_v26 = vsel %vm2147_vm9, %v2069_v23, %v4273_v32  ;;  %v2114_v19 = vsel %vm1831_vm4, %v2092_v54, 0.0  ;;  %v2093_v3 = vmul.f32 %v1820_v5, %v1523_v9  ;;  %v2311_v11 = vld [vmem:[%s4396_s4 + $0x18] sm:$0xff] }
 0x433   :  { %v2098_v6 = vadd.f32 %v2097_v57, %v4276_v1  ;;  %v2087_v18 = vadd.f32 %v2086_v45, %v2085_v8  ;;  %v2094_v13 = vmul.f32 %v1821_v36, %v1530_v48  ;;  %v2106_v59 = vsel %vm1831_vm4, %v2091_v34, 0.0  ;;  %v2308_v36 = vld [vmem:[%s4396_s4] sm:$0xff]  ;;  %v4766_v34 = vld [vmem:[#allocation6_spill] sm:$0xff] }
 0x434   :  { %v1822_v49 = vadd.f32 %v1814_v35, %v1766_v22  ;;  %v2183_v27 = vsel %vm2149_vm10, %v2078_v17, %v2182_v26  ;;  %v2107_v0 = vadd.f32 %v2106_v59, %v2105_v12  ;;  %v2115_v25 = vsel %vm1831_vm4, %v2093_v3, 0.0  ;;  %v4765_v48 = vld [vmem:[#allocation3_spill] sm:$0xff]  ;;  %v4767_v26 = vld [vmem:[#allocation5_spill] sm:$0xff] }
 0x435   :  { %v2099_v47 = vrot.slane %v2098_v6, 4  ;;  %v2184_v33 = vsel %vm2151_vm11, %v2087_v18, %v2183_v27  ;;  %v2116_v32 = vadd.f32 %v2115_v25, %v2114_v19  ;;  %v2123_v1 = vsel %vm1831_vm4, %v2094_v13, 0.0 }
 0x436   :  { %v2095_v23 = vmul.f32 %v1822_v49, %v1534_v52  ;;  %v2108_v62 = vrot.slane %v2107_v0, 4  ;;  %v2584_v14 = vpack.c.bf16 %v2309_v55, %v2308_v36  ;;  %v2588_v63 = vpack.c.bf16 %v2311_v11, %v2310_v61 }
 0x437   :  { %v2100_v54 = vadd.f32 %v2099_v47, %v2098_v6  ;;  %v2117_v58 = vrot.slane %v2116_v32, 4  ;;  %v2313_v52 = vstv %s4397_s5 }
 0x438   :  { %v2124_v44 = vsel %vm1831_vm4, %v2095_v23, 0.0  ;;  %v2109_v7 = vadd.f32 %v2108_v62, %v2107_v0  ;;  %2585 = vmatprep.subr.bf16.mxu0 %v2584_v14  ;;  %2592 = vmatprep.subr.bf16.mxu1 %v2584_v14 }
 0x439   :  { %v2101_v24 = vrot.slane %v2100_v54, 2  ;;  %v2125_v4 = vadd.f32 %v2124_v44, %v2123_v1  ;;  %v2118_v42 = vadd.f32 %v2117_v58, %v2116_v32  ;;  %2587 = vmatpush3.bf16.msra.mxu0 %v2584_v14  ;;  %2594 = vmatpush3.bf16.msra.mxu1 %v2584_v14 }
 0x43a   :  { %v2110_v28 = vrot.slane %v2109_v7, 2  ;;  %2589 = vmatprep.subr.bf16.mxu0 %v2588_v63  ;;  %2593 = vmatprep.subr.bf16.mxu1 %v2588_v63 }
 0x43b   :  { %v2102_v20 = vadd.f32 %v2101_v24, %v2100_v54  ;;  %v2126_v39 = vrot.slane %v2125_v4, 4  ;;  %v2119_v30 = vrot.slane %v2118_v42, 2 }
 0x43c   :  { %v2111_v37 = vadd.f32 %v2110_v28, %v2109_v7 }
 0x43d   :  { %v2103_v15 = vrot.slane %v2102_v20, 1  ;;  %v2127_v56 = vadd.f32 %v2126_v39, %v2125_v4  ;;  %v2120_v53 = vadd.f32 %v2119_v30, %v2118_v42  ;;  %2591 = vmatpush3.bf16.msra.mxu0 %v2588_v63  ;;  %2595 = vmatpush3.bf16.msra.mxu1 %v2588_v63 }
 0x43e   :  { %v2112_v50 = vrot.slane %v2111_v37, 1 }
 0x43f   :  { %v2128_v40 = vrot.slane %v2127_v56, 2  ;;  %v2121_v2 = vrot.slane %v2120_v53, 1  ;;  %v2104_v51 = vadd.f32 %v2103_v15, %v2102_v20 }
 0x440   :  { %v2113_v21 = vadd.f32 %v2112_v50, %v2111_v37 }
 0x441   :  { %v2129_v41 = vadd.f32 %v2128_v40, %v2127_v56  ;;  %v2122_v9 = vadd.f32 %v2121_v2, %v2120_v53 }
 0x442   :  { %v2190_v60 = vsel %vm2136_vm5, %v2113_v21, %v2104_v51 }
 0x443   :  { %v2130_v46 = vrot.slane %v2129_v41, 1  ;;  %v2191_v31 = vsel %vm2138_vm6, %v2122_v9, %v2190_v60 }
 0x445   :  { %v2131_v10 = vadd.f32 %v2130_v46, %v2129_v41 }
 0x447   :  { %v2192_v43 = vsel %vm2140_vm7, %v2131_v10, %v2191_v31 }
 0x448   :  { %v2198_v8 = vsel %vm2194_vm8, %v2184_v33, %v2192_v43 }
 0x449   :  { %2524 = vmatmul.mubr.msk.f32.gmra.mrb[10].mxu1 %vm1831_vm4, %v2198_v8 }
 0x4c3   :  { %v2522_v16 = vpop.f32.mrb[8].mxu1 }
 0x4c4   :  { %v2301_v17 = vadd.f32 %v2522_v16, %v4764_v29  ;;  %v2281_v12 = vpop.f32.mrb[9].mxu1 }
 0x4c5   :  { %v2300_v5 = vadd.f32 %v2281_v12, %v4765_v48 }
 0x4c7   :  { %2638 = vtanh.f32 %v2300_v5 }
 0x4c8   :  { %2640 = vtanh.f32 %v2301_v17 }
 0x4d1   :  { %v2639_v22 = vpop.eup %2638 }
 0x4d2   :  { %v2641_v45 = vpop.eup %2640  ;;  %2534 = vmatprep.mubr.msk.f32.mxu0 %vm1831_vm4, %v2639_v22 }
 0x4d3   :  { %2535 = vmatmul.mubr.msk.f32.vlgmr.msra.gmra.mrb[12].mxu0 %vm1831_vm4, %v2641_v45 }
 0x51c   :  { %v2525_v57 = vpop.f32.mrb[10].mxu1 }
 0x51d   :  { %v2303_v38 = vadd.f32 %v2525_v57, %v4766_v34  ;;  %v2291_v35 = vpop.f32.mrb[11].mxu1 }
 0x51e   :  { %v2302_v19 = vadd.f32 %v2291_v35, %v4767_v26 }
 0x520   :  { %2642 = vtanh.f32 %v2302_v19 }
 0x521   :  { %2644 = vtanh.f32 %v2303_v38 }
 0x52a   :  { %v2643_v6 = vpop.eup %2642 }
 0x52b   :  { %v2645_v3 = vpop.eup %2644  ;;  %2537 = vmatprep.mubr.msk.f32.mxu1 %vm1831_vm4, %v2643_v6 }
 0x52c   :  { %2538 = vmatmul.mubr.msk.f32.vlgmr.msra.gmra.mrb[12].mxu1 %vm1831_vm4, %v2645_v3 }
 0x5a6   :  { %v2536_v18 = vpop.f32.mrb[12].mxu0 }
 0x5a7   :  { %v2398_v13 = vadd.f32 %v2536_v18, %v2313_v52  ;;  %v2392_v59 = vpop.f32.mrb[13].mxu0 }
 0x5a8   :  { %v2393_v49 = vadd.f32 %v2392_v59, %v2313_v52 }
 0x5a9   :  { %v2474_v27 = vmul.f32 -1.442695, %v2398_v13 }
 0x5aa   :  { %v2473_v47 = vmul.f32 -1.442695, %v2393_v49 }
 0x5ab   :  { %2646 = vpow2.f32 %v2474_v27 }
 0x5ac   :  { %2648 = vpow2.f32 %v2473_v47 }
 0x5b5   :  { %v2647_v0 = vpop.eup %2646 }
 0x5b6   :  { %v2649_v25 = vpop.eup %2648  ;;  %v2424_v33 = vadd.f32 1.0, %v2647_v0 }
 0x5b7   :  { %v2423_v32 = vadd.f32 1.0, %v2649_v25 }
 0x5b8   :  { %2650 = vrcp.f32 %v2424_v33 }
 0x5b9   :  { %2652 = vrcp.f32 %v2423_v32 }
 0x5c2   :  { %v2651_v23 = vpop.eup %2650 }
 0x5c3   :  { %v2653_v54 = vpop.eup %2652  ;;  %2437 = vst.msk [vmem:[%s4398_s6 + $0x8] sm:$0xff] %vm2435_vm12, %v2651_v23 }
 0x5c4   :  { %2436 = vst.msk [vmem:[%s4398_s6] sm:$0xff] %vm2435_vm12, %v2653_v54 }
 0x5ff   :  { %v2539_v62 = vpop.f32.mrb[12].mxu1 }
 0x600   :  { %v2408_v1 = vadd.f32 %v2539_v62, %v2313_v52  ;;  %v2402_v58 = vpop.f32.mrb[13].mxu1 }
 0x601   :  { %v2403_v44 = vadd.f32 %v2402_v58, %v2313_v52 }
 0x602   :  { %v2476_v24 = vmul.f32 -1.442695, %v2408_v1 }
 0x603   :  { %v2475_v7 = vmul.f32 -1.442695, %v2403_v44 }
 0x604   :  { %2654 = vpow2.f32 %v2476_v24 }
 0x605   :  { %2656 = vpow2.f32 %v2475_v7 }
 0x60e   :  { %v2655_v4 = vpop.eup %2654 }
 0x60f   :  { %v2657_v42 = vpop.eup %2656  ;;  %v2426_v20 = vadd.f32 1.0, %v2655_v4 }
 0x610   :  { %v2425_v28 = vadd.f32 1.0, %v2657_v42 }
 0x611   :  { %2658 = vrcp.f32 %v2426_v20 }
 0x612   :  { %2660 = vrcp.f32 %v2425_v28 }
 0x61b   :  { %v2659_v39 = vpop.eup %2658 }
 0x61c   :  { %v2661_v30 = vpop.eup %2660  ;;  %2439 = vst.msk [vmem:[%s4398_s6 + $0x18] sm:$0xff] %vm2435_vm12, %v2659_v39 }
 0x61d   :  { %2438 = vst.msk [vmem:[%s4398_s6 + $0x10] sm:$0xff] %vm2435_vm12, %v2661_v30 }

</bundles_post_ra>
